<compile_context>
chip_gen: v7x
topology: tpu7x:2x2x1
jax: 0.10.0
libtpu: 0.0.40
codegen_flags: <defaults>
</compile_context>

<pallas_src>
import functools
import math

import numpy as np
import jax
import jax.numpy as jnp
from jax import lax
from jax.experimental import pallas as pl
from jax.experimental.pallas import tpu as pltpu


# --------------------------------------------------------------------------
# Pallas kernel: one batch element per grid step.
# --------------------------------------------------------------------------
def _esa_kernel(num_heads,
                xp_ref, xres_ref,
                wqkv_ref, bqkv_ref, hmask_ref,
                wp_ref, bp_ref,
                ie_ref, io_ref,
                g_ref, bt_ref,
                out_ref):
    f32 = jnp.float32
    bf16 = jnp.bfloat16
    C = wp_ref.shape[0]

    # --- fused sr-conv + q/k/v projection: one wide bf16 matmul -------------
    qkv = jnp.dot(xp_ref[...].astype(bf16), wqkv_ref[...],
                  preferred_element_type=f32) + bqkv_ref[...]          # (Nr, 3C)
    q = qkv[:, :C]              # 1/sqrt(head_dim) already folded into W / bias
    k = qkv[:, C:2 * C]
    v = qkv[:, 2 * C:]

    # --- stacked multi-head attention: two lane-dense matmuls ---------------
    mask = hmask_ref[...]                                   # (H*Nr, C) f32 0/1
    k_st = (jnp.concatenate([k] * num_heads, axis=0) * mask).astype(bf16)
    v_st = (jnp.concatenate([v] * num_heads, axis=0) * mask).astype(bf16)

    s = lax.dot_general(q.astype(bf16), k_st, (((1,), (1,)), ((), ())),
                        preferred_element_type=f32)                    # (Nr, H*Nr)
    # Global row max is a valid stabilisation shift: it cancels in o_un/denom.
    s = s - jnp.max(s, axis=-1, keepdims=True)
    p = jnp.exp(s).astype(bf16)                                        # (Nr, H*Nr)

    o_un = jnp.dot(p, v_st, preferred_element_type=f32)                # (Nr, C)
    denom = jnp.dot(p, mask.astype(bf16), preferred_element_type=f32)  # (Nr, C)
    attn = o_un * pl.reciprocal(denom, approx=True)

    # --- output 1x1 conv (proj) ----------------------------------------------
    proj = (jnp.dot(attn.astype(bf16), wp_ref[...],
                    preferred_element_type=f32) + bp_ref[...]).astype(bf16)

    # --- bilinear upsample: even / odd output tokens packed two-per-row ------
    up_l = jnp.dot(ie_ref[...], proj, preferred_element_type=f32)      # (HW/2, C)
    up_r = jnp.dot(io_ref[...], proj, preferred_element_type=f32)      # (HW/2, C)
    y2 = jnp.concatenate([up_l, up_r], axis=-1) + xres_ref[...]        # (HW/2, 2C)

    # --- LayerNorm over C channels: two independent tokens per 128-lane row --
    lane = lax.broadcasted_iota(jnp.int32, (1, 2 * C), 1)
    left = lane < C
    inv_c = 1.0 / C
    zl = jnp.where(left, y2, 0.0)
    zr = y2 - zl
    mean = jnp.where(left,
                     jnp.sum(zl, axis=-1, keepdims=True),
                     jnp.sum(zr, axis=-1, keepdims=True)) * inv_c
    d = y2 - mean
    dl = jnp.where(left, d, 0.0)
    dr = d - dl
    var = jnp.where(left,
                    jnp.sum(dl * dl, axis=-1, keepdims=True),
                    jnp.sum(dr * dr, axis=-1, keepdims=True)) * inv_c
    out_ref[...] = d * lax.rsqrt(var + 1e-5) * g_ref[...] + bt_ref[...]


# --------------------------------------------------------------------------
# Bilinear interpolation matrix (matches F.interpolate(mode='bilinear',
# align_corners=False) including the negative-source-index clamp).
# --------------------------------------------------------------------------
def _interp_matrix(out_size, in_size):
    A = np.zeros((out_size, in_size), dtype=np.float32)
    if in_size == 1:
        A[:, 0] = 1.0
        return A
    scale = in_size / out_size
    for i in range(out_size):
        src = (i + 0.5) * scale - 0.5
        if src < 0.0:
            src = 0.0
        i0 = min(int(np.floor(src)), in_size - 1)
        i1 = min(i0 + 1, in_size - 1)
        frac = src - i0
        A[i, i0] += 1.0 - frac
        A[i, i1] += frac
    return A


# --------------------------------------------------------------------------
# Wrapper: weight folding + layout plumbing + pallas_call.
# --------------------------------------------------------------------------
@functools.partial(jax.jit, static_argnames=("num_heads", "reduction_ratio"))
def efficient_self_attention(x, params, *, num_heads, reduction_ratio):
    B, C, H, W = x.shape
    R = reduction_ratio
    assert H % R == 0 and W % R == 0
    assert C % num_heads == 0
    assert (H * W) % 2 == 0
    Hr, Wr = H // R, W // R
    Nr = Hr * Wr
    HW = H * W
    hd = C // num_heads
    RRC = R * R * C
    bf16 = jnp.bfloat16
    f32 = jnp.float32

    # x in "patch" layout: rows = reduced tokens (hr, wr), cols = (rh, rw, c).
    patches = (x.reshape(B, C, Hr, R, Wr, R)
                .transpose(0, 2, 4, 3, 5, 1)            # (B, hr, wr, rh, rw, c)
                .reshape(B, Nr, RRC))
    # Residual / LayerNorm input: the SAME buffer viewed as (tokens, C), two
    # tokens per 128-lane row (token order (hr, wr, rh, rw)) — a pure reshape.
    xres = patches.reshape(B, HW // 2, 2 * C)

    # --- fold sr-conv into q/k/v (f32), fold score scale, cast once to bf16 --
    scale = 1.0 / math.sqrt(hd)
    w_sr = params["w_sr"].transpose(2, 3, 1, 0).reshape(RRC, C)   # (rh,rw,cin)xcout
    w_q = params["w_q"].reshape(C, C).T * scale
    w_k = params["w_k"].reshape(C, C).T
    w_v = params["w_v"].reshape(C, C).T
    w_qkv = jnp.concatenate([w_q, w_k, w_v], axis=1)                   # (C, 3C)
    b_qkv = jnp.concatenate([params["b_q"] * scale, params["b_k"], params["b_v"]])
    w_fused = (w_sr @ w_qkv).astype(bf16)                              # (RRC, 3C)
    b_fused = (params["b_sr"].reshape(1, C) @ w_qkv
               + b_qkv.reshape(1, 3 * C)).astype(f32)                  # (1, 3C)

    w_p = params["w_p"].reshape(C, C).T.astype(bf16)
    b_p = params["b_p"].reshape(1, C).astype(f32)

    # --- per-head block mask: mask[h*Nr + j, c] = (c // hd == h) --------------
    head_of_c = np.arange(C) // hd
    row_head = np.repeat(np.arange(num_heads), Nr)
    hmask = jnp.asarray((row_head[:, None] == head_of_c[None, :])
                        .astype(np.float32))                           # (H*Nr, C)

    # --- bilinear (align_corners=False) matrix, permuted to patch token order,
    #     split into even / odd token rows; entries are exact in bf16 ----------
    interp = np.kron(_interp_matrix(H, Hr), _interp_matrix(W, Wr))     # (HW, Nr)
    perm = (np.arange(HW).reshape(Hr, R, Wr, R)
              .transpose(0, 2, 1, 3).reshape(-1))                      # new -> old
    interp_p = interp[perm]
    interp_even = jnp.asarray(interp_p[0::2], dtype=bf16)              # (HW/2, Nr)
    interp_odd = jnp.asarray(interp_p[1::2], dtype=bf16)               # (HW/2, Nr)

    gamma2 = jnp.tile(params["gamma"].reshape(1, C), (1, 2))           # (1, 2C)
    beta2 = jnp.tile(params["beta"].reshape(1, C), (1, 2))

    kernel = functools.partial(_esa_kernel, num_heads)

    def batch_spec(n, c):
        return pl.BlockSpec((pl.Squeezed(), n, c), lambda b: (b, 0, 0))

    def shared_spec(shape):
        return pl.BlockSpec(shape, lambda b: tuple(0 for _ in shape))

    out2 = pl.pallas_call(
        kernel,
        out_shape=jax.ShapeDtypeStruct((B, HW // 2, 2 * C), jnp.float32),
        grid=(B,),
        in_specs=[
            batch_spec(Nr, RRC),                           # patches (matmul view)
            batch_spec(HW // 2, 2 * C),                    # residual (lane-dense)
            shared_spec((RRC, 3 * C)),                     # fused sr+qkv weight
            shared_spec((1, 3 * C)),                       # fused bias
            shared_spec((num_heads * Nr, C)),              # per-head block mask
            shared_spec((C, C)), shared_spec((1, C)),      # proj
            shared_spec((HW // 2, Nr)),                    # interp (even tokens)
            shared_spec((HW // 2, Nr)),                    # interp (odd tokens)
            shared_spec((1, 2 * C)), shared_spec((1, 2 * C)),  # LN gamma / beta
        ],
        out_specs=batch_spec(HW // 2, 2 * C),
        compiler_params=pltpu.CompilerParams(dimension_semantics=("parallel",)),
    )(patches, xres, w_fused, b_fused, hmask, w_p, b_p,
      interp_even, interp_odd, gamma2, beta2)

    # (B, HW/2, 2C) -> tokens in (hr, wr, rh, rw) order -> NCHW
    out = (out2.reshape(B, Hr, Wr, R, R, C)
                .transpose(0, 5, 1, 3, 2, 4)
                .reshape(B, C, H, W))
    return out


# --------------------------------------------------------------------------
# Pure-JAX reference (f32, same math as the PyTorch module) for a sanity check.
# --------------------------------------------------------------------------
def reference_forward(x, params, *, num_heads, reduction_ratio):
    B, C, H, W = x.shape
    R = reduction_ratio
    Hr, Wr = H // R, W // R
    Nr = Hr * Wr
    hd = C // num_heads
    patches = (x.reshape(B, C, Hr, R, Wr, R)
                .transpose(0, 2, 4, 1, 3, 5)
                .reshape(B, Nr, C * R * R))
    xr = patches @ params["w_sr"].reshape(C, -1).T + params["b_sr"]
    q = xr @ params["w_q"].reshape(C, C).T + params["b_q"]
    k = xr @ params["w_k"].reshape(C, C).T + params["b_k"]
    v = xr @ params["w_v"].reshape(C, C).T + params["b_v"]
    qh = q.reshape(B, Nr, num_heads, hd)
    kh = k.reshape(B, Nr, num_heads, hd)
    vh = v.reshape(B, Nr, num_heads, hd)
    s = jnp.einsum("bihd,bjhd->bhij", qh, kh) / math.sqrt(hd)
    p = jax.nn.softmax(s, axis=-1)
    o = jnp.einsum("bhij,bjhd->bihd", p, vh).reshape(B, Nr, C)
    proj = o @ params["w_p"].reshape(C, C).T + params["b_p"]
    interp = jnp.asarray(np.kron(_interp_matrix(H, Hr), _interp_matrix(W, Wr)))
    up = jnp.einsum("ns,bsc->bnc", interp, proj)
    y = up + x.transpose(0, 2, 3, 1).reshape(B, H * W, C)
    mean = y.mean(-1, keepdims=True)
    var = ((y - mean) ** 2).mean(-1, keepdims=True)
    y = (y - mean) / jnp.sqrt(var + 1e-5) * params["gamma"] + params["beta"]
    return y.reshape(B, H, W, C).transpose(0, 3, 1, 2)


# --------------------------------------------------------------------------
if __name__ == "__main__":
    B, C, H, W = 2, 64, 16, 16
    num_heads = 8
    reduction_ratio = 4
    R = reduction_ratio

    key = jax.random.PRNGKey(0)
    ks = jax.random.split(key, 12)
    params = {
        "w_sr": jax.random.normal(ks[0], (C, C, R, R), jnp.float32) * 0.05,
        "b_sr": jax.random.normal(ks[1], (C,), jnp.float32) * 0.05,
        "w_q": jax.random.normal(ks[2], (C, C, 1, 1), jnp.float32) * 0.05,
        "b_q": jax.random.normal(ks[3], (C,), jnp.float32) * 0.05,
        "w_k": jax.random.normal(ks[4], (C, C, 1, 1), jnp.float32) * 0.05,
        "b_k": jax.random.normal(ks[5], (C,), jnp.float32) * 0.05,
        "w_v": jax.random.normal(ks[6], (C, C, 1, 1), jnp.float32) * 0.05,
        "b_v": jax.random.normal(ks[7], (C,), jnp.float32) * 0.05,
        "w_p": jax.random.normal(ks[8], (C, C, 1, 1), jnp.float32) * 0.05,
        "b_p": jax.random.normal(ks[9], (C,), jnp.float32) * 0.05,
        "gamma": jnp.ones((C,), jnp.float32),   # PyTorch LayerNorm defaults
        "beta": jnp.zeros((C,), jnp.float32),
    }
    x = jax.random.normal(ks[10], (B, C, H, W), jnp.float32)

    out = efficient_self_attention(x, params, num_heads=num_heads,
                                   reduction_ratio=reduction_ratio)
    out = jax.block_until_ready(out)

    ref = jax.block_until_ready(
        reference_forward(x, params, num_heads=num_heads,
                          reduction_ratio=reduction_ratio))

    assert out.shape == (B, C, H, W)
    # bf16 MXU inputs (f32 accumulation) + approx reciprocal -> relaxed tolerance.
    np.testing.assert_allclose(np.asarray(out), np.asarray(ref),
                               rtol=3e-2, atol=3e-2)
    print("KERNEL_OK")
</pallas_src>

<mosaic_0001>
module attributes {stable_mosaic.version = 11 : i64} {
  func.func @_esa_kernel(%arg0: i32, %arg1: memref<1x16x1024xf32, #tpu.memory_space<vmem>>, %arg2: memref<1x128x128xf32, #tpu.memory_space<vmem>>, %arg3: memref<1024x192xbf16, #tpu.memory_space<vmem>>, %arg4: memref<1x192xf32, #tpu.memory_space<vmem>>, %arg5: memref<128x64xf32, #tpu.memory_space<vmem>>, %arg6: memref<64x64xbf16, #tpu.memory_space<vmem>>, %arg7: memref<1x64xf32, #tpu.memory_space<vmem>>, %arg8: memref<128x16xbf16, #tpu.memory_space<vmem>>, %arg9: memref<128x16xbf16, #tpu.memory_space<vmem>>, %arg10: memref<1x128xf32, #tpu.memory_space<vmem>>, %arg11: memref<1x128xf32, #tpu.memory_space<vmem>>, %arg12: memref<1x128x128xf32, #tpu.memory_space<vmem>>) attributes {dimension_semantics = [#tpu.dimension_semantics<parallel>], iteration_bounds = array<i64: 2>, scalar_prefetch = 0 : i64, scratch_operands = 0 : i64, tpu.core_type = #tpu.core_type<tc>, window_params = [{transform_indices = @transform_0, window_bounds = array<i64: 1, 16, 1024>}, {transform_indices = @transform_1, window_bounds = array<i64: 1, 128, 128>}, {pipeline_mode = #tpu.pipeline_mode<synchronous>, transform_indices = @transform_2, window_bounds = array<i64: 1024, 192>}, {pipeline_mode = #tpu.pipeline_mode<synchronous>, transform_indices = @transform_3, window_bounds = array<i64: 1, 192>}, {pipeline_mode = #tpu.pipeline_mode<synchronous>, transform_indices = @transform_4, window_bounds = array<i64: 128, 64>}, {pipeline_mode = #tpu.pipeline_mode<synchronous>, transform_indices = @transform_5, window_bounds = array<i64: 64, 64>}, {pipeline_mode = #tpu.pipeline_mode<synchronous>, transform_indices = @transform_6, window_bounds = array<i64: 1, 64>}, {pipeline_mode = #tpu.pipeline_mode<synchronous>, transform_indices = @transform_7, window_bounds = array<i64: 128, 16>}, {pipeline_mode = #tpu.pipeline_mode<synchronous>, transform_indices = @transform_8, window_bounds = array<i64: 128, 16>}, {pipeline_mode = #tpu.pipeline_mode<synchronous>, transform_indices = @transform_9, window_bounds = array<i64: 1, 128>}, {pipeline_mode = #tpu.pipeline_mode<synchronous>, transform_indices = @transform_10, window_bounds = array<i64: 1, 128>}, {transform_indices = @transform_11, window_bounds = array<i64: 1, 128, 128>}]} {
    %c0 = arith.constant 0 : index
    %c0_0 = arith.constant 0 : index
    %c0_1 = arith.constant 0 : index
    %0 = vector.load %arg1[%c0, %c0_0, %c0_1] : memref<1x16x1024xf32, #tpu.memory_space<vmem>>, vector<1x16x1024xf32>
    %1 = vector.shape_cast %0 : vector<1x16x1024xf32> to vector<16x1024xf32>
    %2 = arith.truncf %1 : vector<16x1024xf32> to vector<16x1024xbf16>
    %c0_2 = arith.constant 0 : index
    %c0_3 = arith.constant 0 : index
    %3 = vector.load %arg3[%c0_2, %c0_3] : memref<1024x192xbf16, #tpu.memory_space<vmem>>, vector<1024x192xbf16>
    %cst = arith.constant dense<0.000000e+00> : vector<16x192xf32>
    %4 = tpu.matmul %2, %3, %cst {dimension_numbers = #tpu.dot_dimension_numbers<[1], [0], [0], [1], [0, 0, 1, 1], [], []>} : vector<16x1024xbf16>, vector<1024x192xbf16>, vector<16x192xf32> -> vector<16x192xf32>
    %c0_4 = arith.constant 0 : index
    %c0_5 = arith.constant 0 : index
    %5 = vector.load %arg4[%c0_4, %c0_5] : memref<1x192xf32, #tpu.memory_space<vmem>>, vector<1x192xf32>
    %6 = vector.broadcast %5 : vector<1x192xf32> to vector<16x192xf32>
    %7 = arith.addf %4, %6 : vector<16x192xf32>
    %8 = vector.extract_strided_slice %7 {offsets = [0, 0], sizes = [16, 64], strides = [1, 1]} : vector<16x192xf32> to vector<16x64xf32>
    %9 = vector.extract_strided_slice %7 {offsets = [0, 64], sizes = [16, 64], strides = [1, 1]} : vector<16x192xf32> to vector<16x64xf32>
    %10 = vector.extract_strided_slice %7 {offsets = [0, 128], sizes = [16, 64], strides = [1, 1]} : vector<16x192xf32> to vector<16x64xf32>
    %c0_6 = arith.constant 0 : index
    %c0_7 = arith.constant 0 : index
    %11 = vector.load %arg5[%c0_6, %c0_7] : memref<128x64xf32, #tpu.memory_space<vmem>>, vector<128x64xf32>
    %12 = tpu.concatenate %9, %9, %9, %9, %9, %9, %9, %9 in 0 : vector<16x64xf32>, vector<16x64xf32>, vector<16x64xf32>, vector<16x64xf32>, vector<16x64xf32>, vector<16x64xf32>, vector<16x64xf32>, vector<16x64xf32> -> vector<128x64xf32>
    %13 = arith.mulf %12, %11 : vector<128x64xf32>
    %14 = arith.truncf %13 : vector<128x64xf32> to vector<128x64xbf16>
    %15 = tpu.concatenate %10, %10, %10, %10, %10, %10, %10, %10 in 0 : vector<16x64xf32>, vector<16x64xf32>, vector<16x64xf32>, vector<16x64xf32>, vector<16x64xf32>, vector<16x64xf32>, vector<16x64xf32>, vector<16x64xf32> -> vector<128x64xf32>
    %16 = arith.mulf %15, %11 : vector<128x64xf32>
    %17 = arith.truncf %16 : vector<128x64xf32> to vector<128x64xbf16>
    %18 = arith.truncf %8 : vector<16x64xf32> to vector<16x64xbf16>
    %cst_8 = arith.constant dense<0.000000e+00> : vector<16x128xf32>
    %19 = tpu.matmul %18, %14, %cst_8 {dimension_numbers = #tpu.dot_dimension_numbers<[1], [1], [0], [0], [0, 0, 1, 0], [], []>} : vector<16x64xbf16>, vector<128x64xbf16>, vector<16x128xf32> -> vector<16x128xf32>
    %cst_9 = arith.constant dense<0xFF800000> : vector<16xf32>
    %20 = vector.multi_reduction <maximumf>, %19, %cst_9 [1] : vector<16x128xf32> to vector<16xf32>
    %21 = vector.shape_cast %20 : vector<16xf32> to vector<16x1xf32>
    %22 = vector.broadcast %21 : vector<16x1xf32> to vector<16x128xf32>
    %23 = arith.subf %19, %22 : vector<16x128xf32>
    %24 = math.exp %23 : vector<16x128xf32>
    %25 = arith.truncf %24 : vector<16x128xf32> to vector<16x128xbf16>
    %cst_10 = arith.constant dense<0.000000e+00> : vector<16x64xf32>
    %26 = tpu.matmul %25, %17, %cst_10 {dimension_numbers = #tpu.dot_dimension_numbers<[1], [0], [0], [1], [0, 0, 1, 1], [], []>} : vector<16x128xbf16>, vector<128x64xbf16>, vector<16x64xf32> -> vector<16x64xf32>
    %27 = arith.truncf %11 : vector<128x64xf32> to vector<128x64xbf16>
    %cst_11 = arith.constant dense<0.000000e+00> : vector<16x64xf32>
    %28 = tpu.matmul %25, %27, %cst_11 {dimension_numbers = #tpu.dot_dimension_numbers<[1], [0], [0], [1], [0, 0, 1, 1], [], []>} : vector<16x128xbf16>, vector<128x64xbf16>, vector<16x64xf32> -> vector<16x64xf32>
    %29 = tpu.reciprocal %28 {approx = true} : vector<16x64xf32> -> vector<16x64xf32>
    %30 = arith.mulf %26, %29 : vector<16x64xf32>
    %31 = arith.truncf %30 : vector<16x64xf32> to vector<16x64xbf16>
    %c0_12 = arith.constant 0 : index
    %c0_13 = arith.constant 0 : index
    %32 = vector.load %arg6[%c0_12, %c0_13] : memref<64x64xbf16, #tpu.memory_space<vmem>>, vector<64x64xbf16>
    %cst_14 = arith.constant dense<0.000000e+00> : vector<16x64xf32>
    %33 = tpu.matmul %31, %32, %cst_14 {dimension_numbers = #tpu.dot_dimension_numbers<[1], [0], [0], [1], [0, 0, 1, 1], [], []>} : vector<16x64xbf16>, vector<64x64xbf16>, vector<16x64xf32> -> vector<16x64xf32>
    %c0_15 = arith.constant 0 : index
    %c0_16 = arith.constant 0 : index
    %34 = vector.load %arg7[%c0_15, %c0_16] : memref<1x64xf32, #tpu.memory_space<vmem>>, vector<1x64xf32>
    %35 = vector.broadcast %34 : vector<1x64xf32> to vector<16x64xf32>
    %36 = arith.addf %33, %35 : vector<16x64xf32>
    %37 = arith.truncf %36 : vector<16x64xf32> to vector<16x64xbf16>
    %c0_17 = arith.constant 0 : index
    %c0_18 = arith.constant 0 : index
    %38 = vector.load %arg8[%c0_17, %c0_18] : memref<128x16xbf16, #tpu.memory_space<vmem>>, vector<128x16xbf16>
    %cst_19 = arith.constant dense<0.000000e+00> : vector<128x64xf32>
    %39 = tpu.matmul %38, %37, %cst_19 {dimension_numbers = #tpu.dot_dimension_numbers<[1], [0], [0], [1], [0, 0, 1, 1], [], []>} : vector<128x16xbf16>, vector<16x64xbf16>, vector<128x64xf32> -> vector<128x64xf32>
    %c0_20 = arith.constant 0 : index
    %c0_21 = arith.constant 0 : index
    %40 = vector.load %arg9[%c0_20, %c0_21] : memref<128x16xbf16, #tpu.memory_space<vmem>>, vector<128x16xbf16>
    %cst_22 = arith.constant dense<0.000000e+00> : vector<128x64xf32>
    %41 = tpu.matmul %40, %37, %cst_22 {dimension_numbers = #tpu.dot_dimension_numbers<[1], [0], [0], [1], [0, 0, 1, 1], [], []>} : vector<128x16xbf16>, vector<16x64xbf16>, vector<128x64xf32> -> vector<128x64xf32>
    %42 = tpu.concatenate %39, %41 in 1 : vector<128x64xf32>, vector<128x64xf32> -> vector<128x128xf32>
    %c0_23 = arith.constant 0 : index
    %c0_24 = arith.constant 0 : index
    %c0_25 = arith.constant 0 : index
    %43 = vector.load %arg2[%c0_23, %c0_24, %c0_25] : memref<1x128x128xf32, #tpu.memory_space<vmem>>, vector<1x128x128xf32>
    %44 = vector.shape_cast %43 : vector<1x128x128xf32> to vector<128x128xf32>
    %45 = arith.addf %42, %44 : vector<128x128xf32>
    %46 = tpu.iota {dimensions = array<i32: 1>} : vector<1x128xi32>
    %c64_i32 = arith.constant 64 : i32
    %47 = vector.broadcast %c64_i32 : i32 to vector<1x128xi32>
    %48 = arith.cmpi slt, %46, %47 : vector<1x128xi32>
    %cst_26 = arith.constant 0.000000e+00 : f32
    %49 = vector.shape_cast %48 : vector<1x128xi1> to vector<1x128xi1>
    %50 = vector.broadcast %49 : vector<1x128xi1> to vector<128x128xi1>
    %51 = vector.broadcast %cst_26 : f32 to vector<128x128xf32>
    %52 = arith.select %50, %45, %51 : vector<128x128xi1>, vector<128x128xf32>
    %53 = arith.subf %45, %52 : vector<128x128xf32>
    %cst_27 = arith.constant dense<0.000000e+00> : vector<128xf32>
    %54 = vector.multi_reduction <add>, %52, %cst_27 [1] : vector<128x128xf32> to vector<128xf32>
    %55 = vector.shape_cast %54 : vector<128xf32> to vector<128x1xf32>
    %cst_28 = arith.constant dense<0.000000e+00> : vector<128xf32>
    %56 = vector.multi_reduction <add>, %53, %cst_28 [1] : vector<128x128xf32> to vector<128xf32>
    %57 = vector.shape_cast %56 : vector<128xf32> to vector<128x1xf32>
    %58 = vector.shape_cast %48 : vector<1x128xi1> to vector<1x128xi1>
    %59 = vector.broadcast %58 : vector<1x128xi1> to vector<128x128xi1>
    %60 = vector.shape_cast %55 : vector<128x1xf32> to vector<128x1xf32>
    %61 = vector.broadcast %60 : vector<128x1xf32> to vector<128x128xf32>
    %62 = vector.shape_cast %57 : vector<128x1xf32> to vector<128x1xf32>
    %63 = vector.broadcast %62 : vector<128x1xf32> to vector<128x128xf32>
    %64 = arith.select %59, %61, %63 : vector<128x128xi1>, vector<128x128xf32>
    %cst_29 = arith.constant 1.562500e-02 : f32
    %65 = vector.broadcast %cst_29 : f32 to vector<128x128xf32>
    %66 = arith.mulf %64, %65 : vector<128x128xf32>
    %67 = arith.subf %45, %66 : vector<128x128xf32>
    %cst_30 = arith.constant 0.000000e+00 : f32
    %68 = vector.shape_cast %48 : vector<1x128xi1> to vector<1x128xi1>
    %69 = vector.broadcast %68 : vector<1x128xi1> to vector<128x128xi1>
    %70 = vector.broadcast %cst_30 : f32 to vector<128x128xf32>
    %71 = arith.select %69, %67, %70 : vector<128x128xi1>, vector<128x128xf32>
    %72 = arith.subf %67, %71 : vector<128x128xf32>
    %73 = arith.mulf %71, %71 : vector<128x128xf32>
    %cst_31 = arith.constant dense<0.000000e+00> : vector<128xf32>
    %74 = vector.multi_reduction <add>, %73, %cst_31 [1] : vector<128x128xf32> to vector<128xf32>
    %75 = vector.shape_cast %74 : vector<128xf32> to vector<128x1xf32>
    %76 = arith.mulf %72, %72 : vector<128x128xf32>
    %cst_32 = arith.constant dense<0.000000e+00> : vector<128xf32>
    %77 = vector.multi_reduction <add>, %76, %cst_32 [1] : vector<128x128xf32> to vector<128xf32>
    %78 = vector.shape_cast %77 : vector<128xf32> to vector<128x1xf32>
    %79 = vector.shape_cast %48 : vector<1x128xi1> to vector<1x128xi1>
    %80 = vector.broadcast %79 : vector<1x128xi1> to vector<128x128xi1>
    %81 = vector.shape_cast %75 : vector<128x1xf32> to vector<128x1xf32>
    %82 = vector.broadcast %81 : vector<128x1xf32> to vector<128x128xf32>
    %83 = vector.shape_cast %78 : vector<128x1xf32> to vector<128x1xf32>
    %84 = vector.broadcast %83 : vector<128x1xf32> to vector<128x128xf32>
    %85 = arith.select %80, %82, %84 : vector<128x128xi1>, vector<128x128xf32>
    %cst_33 = arith.constant 1.562500e-02 : f32
    %86 = vector.broadcast %cst_33 : f32 to vector<128x128xf32>
    %87 = arith.mulf %85, %86 : vector<128x128xf32>
    %cst_34 = arith.constant 9.99999974E-6 : f32
    %88 = vector.broadcast %cst_34 : f32 to vector<128x128xf32>
    %89 = arith.addf %87, %88 : vector<128x128xf32>
    %90 = math.rsqrt %89 : vector<128x128xf32>
    %91 = arith.mulf %67, %90 : vector<128x128xf32>
    %c0_35 = arith.constant 0 : index
    %c0_36 = arith.constant 0 : index
    %92 = vector.load %arg10[%c0_35, %c0_36] : memref<1x128xf32, #tpu.memory_space<vmem>>, vector<1x128xf32>
    %93 = vector.broadcast %92 : vector<1x128xf32> to vector<128x128xf32>
    %94 = arith.mulf %91, %93 : vector<128x128xf32>
    %c0_37 = arith.constant 0 : index
    %c0_38 = arith.constant 0 : index
    %95 = vector.load %arg11[%c0_37, %c0_38] : memref<1x128xf32, #tpu.memory_space<vmem>>, vector<1x128xf32>
    %96 = vector.broadcast %95 : vector<1x128xf32> to vector<128x128xf32>
    %97 = arith.addf %94, %96 : vector<128x128xf32>
    %c0_39 = arith.constant 0 : index
    %c0_40 = arith.constant 0 : index
    %c0_41 = arith.constant 0 : index
    %98 = vector.load %arg12[%c0_39, %c0_40, %c0_41] : memref<1x128x128xf32, #tpu.memory_space<vmem>>, vector<1x128x128xf32>
    %99 = vector.shape_cast %98 : vector<1x128x128xf32> to vector<128x128xf32>
    %100 = vector.shape_cast %97 : vector<128x128xf32> to vector<1x128x128xf32>
    tpu.vector_store %arg12[%c0_39, %c0_40, %c0_41], %100 {strides = array<i32>} : memref<1x128x128xf32, #tpu.memory_space<vmem>>, vector<1x128x128xf32>,
    return
  }
  func.func @transform_0(%arg0: i32) -> (i32, i32, i32) {
    %c0_i32 = arith.constant 0 : i32
    %c0_i32_0 = arith.constant 0 : i32
    %c0_i32_1 = arith.constant 0 : i32
    return %arg0, %c0_i32, %c0_i32_0 : i32, i32, i32
  }
  func.func @transform_1(%arg0: i32) -> (i32, i32, i32) {
    %c0_i32 = arith.constant 0 : i32
    %c0_i32_0 = arith.constant 0 : i32
    %c0_i32_1 = arith.constant 0 : i32
    return %arg0, %c0_i32, %c0_i32_0 : i32, i32, i32
  }
  func.func @transform_2(%arg0: i32) -> (i32, i32) {
    %c0_i32 = arith.constant 0 : i32
    %c0_i32_0 = arith.constant 0 : i32
    %c0_i32_1 = arith.constant 0 : i32
    return %c0_i32, %c0_i32_0 : i32, i32
  }
  func.func @transform_3(%arg0: i32) -> (i32, i32) {
    %c0_i32 = arith.constant 0 : i32
    %c0_i32_0 = arith.constant 0 : i32
    %c0_i32_1 = arith.constant 0 : i32
    return %c0_i32, %c0_i32_0 : i32, i32
  }
  func.func @transform_4(%arg0: i32) -> (i32, i32) {
    %c0_i32 = arith.constant 0 : i32
    %c0_i32_0 = arith.constant 0 : i32
    %c0_i32_1 = arith.constant 0 : i32
    return %c0_i32, %c0_i32_0 : i32, i32
  }
  func.func @transform_5(%arg0: i32) -> (i32, i32) {
    %c0_i32 = arith.constant 0 : i32
    %c0_i32_0 = arith.constant 0 : i32
    %c0_i32_1 = arith.constant 0 : i32
    return %c0_i32, %c0_i32_0 : i32, i32
  }
  func.func @transform_6(%arg0: i32) -> (i32, i32) {
    %c0_i32 = arith.constant 0 : i32
    %c0_i32_0 = arith.constant 0 : i32
    %c0_i32_1 = arith.constant 0 : i32
    return %c0_i32, %c0_i32_0 : i32, i32
  }
  func.func @transform_7(%arg0: i32) -> (i32, i32) {
    %c0_i32 = arith.constant 0 : i32
    %c0_i32_0 = arith.constant 0 : i32
    %c0_i32_1 = arith.constant 0 : i32
    return %c0_i32, %c0_i32_0 : i32, i32
  }
  func.func @transform_8(%arg0: i32) -> (i32, i32) {
    %c0_i32 = arith.constant 0 : i32
    %c0_i32_0 = arith.constant 0 : i32
    %c0_i32_1 = arith.constant 0 : i32
    return %c0_i32, %c0_i32_0 : i32, i32
  }
  func.func @transform_9(%arg0: i32) -> (i32, i32) {
    %c0_i32 = arith.constant 0 : i32
    %c0_i32_0 = arith.constant 0 : i32
    %c0_i32_1 = arith.constant 0 : i32
    return %c0_i32, %c0_i32_0 : i32, i32
  }
  func.func @transform_10(%arg0: i32) -> (i32, i32) {
    %c0_i32 = arith.constant 0 : i32
    %c0_i32_0 = arith.constant 0 : i32
    %c0_i32_1 = arith.constant 0 : i32
    return %c0_i32, %c0_i32_0 : i32, i32
  }
  func.func @transform_11(%arg0: i32) -> (i32, i32, i32) {
    %c0_i32 = arith.constant 0 : i32
    %c0_i32_0 = arith.constant 0 : i32
    %c0_i32_1 = arith.constant 0 : i32
    return %arg0, %c0_i32, %c0_i32_0 : i32, i32, i32
  }
}

</mosaic_0001>

<bundles_post_ra>
// kernel: efficient_self_attention.1
= control target key start
LH: loop header
LB: loop body
LE: loop exit
PB: predicated region body
PF: predicated region fallthrough
CT: control target
= control target key end

     0   :  { %s3442_s17 = smov 0   ;;  %s4646_s0 = inlined_call_operand.vmem [shape: f32[2,16,1024], index: 0, kind: input, shape index: {}]   ;;  %s4647_s1 = inlined_call_operand.vmem [shape: f32[2,128,128], index: 1, kind: input, shape index: {}]   ;;  %s4648_s2 = inlined_call_operand.vmem [shape: bf16[1024,192], index: 2, kind: input, shape index: {}]   ;;  %s4649_s3 = inlined_call_operand.vmem [shape: f32[1,192], index: 3, kind: input, shape index: {}]   ;;  %s4650_s4 = inlined_call_operand.vmem [shape: f32[128,64], index: 4, kind: input, shape index: {}]   ;;  %s4651_s5 = inlined_call_operand.vmem [shape: bf16[64,64], index: 5, kind: input, shape index: {}]   ;;  %s4652_s6 = inlined_call_operand.vmem [shape: f32[1,64], index: 6, kind: input, shape index: {}]   ;;  %s4653_s7 = inlined_call_operand.vmem [shape: bf16[128,16], index: 7, kind: input, shape index: {}]   ;;  %s4654_s8 = inlined_call_operand.vmem [shape: bf16[128,16], index: 8, kind: input, shape index: {}]   ;;  %s4655_s9 = inlined_call_operand.vmem [shape: f32[1,128], index: 9, kind: input, shape index: {}]   ;;  %s4656_s10 = inlined_call_operand.vmem [shape: f32[1,128], index: 10, kind: input, shape index: {}]   ;;  %s4657_s11 = inlined_call_operand.vmem [shape: f32[2,128,128], index: 11, kind: output, shape index: {}]  }
   0x1 LB: > { %s2749_s18 = sadd.s32 4294967295, %s3377_s17   ;;  %p2753_p0 = scmp.ge.s32.totalorder %s3377_s17, 1  ;;  %s3377_s17 = sphi %s3442_s17, %s21_s17  }
   0x2   : > { %p347_p1 = scmp.lt.s32.totalorder %s3377_s17, 3 }
   0x4   : > { %p348_p2 = pnand %p2753_p0, %p347_p1 }
   0x5   : > { %v3119_v0 = vld [vmem:[%s4648_s2 + $0x4] ss:$8 sps:$4 sm:$0xff] (!%p348_p2)   ;;  %v3121_v1 = vld [vmem:[%s4648_s2] ss:$8 sps:$4 sm:$0xff] (!%p348_p2)   ;;  %v3122_v2 = vld [vmem:[%s4648_s2 + $0x14] ss:$8 sps:$4 sm:$0xff] (!%p348_p2)  }
   0x6   : > { %351 = sbr.rel (%p348_p2) target bundleno = 2271 (0x8df), region = 64  ;;  %1212 = vmatprep.subr.bf16.mxu0 (!%p348_p2), %v3119_v0  ;;  %v3124_v3 = vld [vmem:[%s4648_s2 + $0x10] ss:$8 sps:$4 sm:$0xff] (!%p348_p2)   ;;  %v3125_v4 = vld [vmem:[%s4648_s2 + $0x24] ss:$8 sps:$4 sm:$0xff] (!%p348_p2)   ;;  %p392_p3 = scmp.lt.s32.totalorder (!%p348_p2), %s2749_s18, 1 }
   0x7   : > { %1213 = vmatpush1.bf16.msra.mxu0 (!%p348_p2), %v3121_v1  ;;  %v3127_v5 = vld [vmem:[%s4648_s2 + $0x20] ss:$8 sps:$4 sm:$0xff] (!%p348_p2)   ;;  %v3128_v6 = vld [vmem:[%s4648_s2 + $0x34] ss:$8 sps:$4 sm:$0xff] (!%p348_p2)   ;;  %v3130_v7 = vld [vmem:[%s4648_s2 + $0x30] ss:$8 sps:$4 sm:$0xff] (!%p348_p2)  }
   0x8   : > { %1214 = vmatprep.subr.bf16.mxu0 (!%p348_p2), %v3122_v2  ;;  %v3131_v8 = vld [vmem:[%s4648_s2 + $0x44] ss:$8 sps:$4 sm:$0xff] (!%p348_p2)   ;;  %v3133_v9 = vld [vmem:[%s4648_s2 + $0x40] ss:$8 sps:$4 sm:$0xff] (!%p348_p2)   ;;  %v3134_v10 = vld [vmem:[%s4648_s2 + $0x54] ss:$8 sps:$4 sm:$0xff] (!%p348_p2)  }
   0x9   : > { %v3136_v11 = vld [vmem:[%s4648_s2 + $0x50] ss:$8 sps:$4 sm:$0xff] (!%p348_p2)   ;;  %v3137_v12 = vld [vmem:[%s4648_s2 + $0x64] ss:$8 sps:$4 sm:$0xff] (!%p348_p2)   ;;  %v3139_v16 = vld [vmem:[%s4648_s2 + $0x60] ss:$8 sps:$4 sm:$0xff] (!%p348_p2)  }
   0xa   : > { %v3140_v17 = vld [vmem:[%s4648_s2 + $0x74] ss:$8 sps:$4 sm:$0xff] (!%p348_p2)   ;;  %v3142_v18 = vld [vmem:[%s4648_s2 + $0x70] ss:$8 sps:$4 sm:$0xff] (!%p348_p2)   ;;  %v3143_v19 = vld [vmem:[%s4648_s2 + $0x84] ss:$8 sps:$4 sm:$0xff] (!%p348_p2)  }
   0xb   : > { %1215 = vmatpush1.bf16.msra.mxu0 (!%p348_p2), %v3124_v3  ;;  %v3145_v20 = vld [vmem:[%s4648_s2 + $0x80] ss:$8 sps:$4 sm:$0xff] (!%p348_p2)   ;;  %v3146_v21 = vld [vmem:[%s4648_s2 + $0x94] ss:$8 sps:$4 sm:$0xff] (!%p348_p2)   ;;  %v3148_v22 = vld [vmem:[%s4648_s2 + $0x90] ss:$8 sps:$4 sm:$0xff] (!%p348_p2)  }
   0xc   : > { %1216 = vmatprep.subr.bf16.mxu0 (!%p348_p2), %v3125_v4  ;;  %v3149_v23 = vld [vmem:[%s4648_s2 + $0xa4] ss:$8 sps:$4 sm:$0xff] (!%p348_p2)   ;;  %v3151_v24 = vld [vmem:[%s4648_s2 + $0xa0] ss:$8 sps:$4 sm:$0xff] (!%p348_p2)   ;;  %v3152_v25 = vld [vmem:[%s4648_s2 + $0xb4] ss:$8 sps:$4 sm:$0xff] (!%p348_p2)  }
   0xd   : > { %s4659_s18 = smov (!%p392_p3, %s2749_s18), 1  ;;  %v3154_v26 = vld [vmem:[%s4648_s2 + $0xb0] ss:$8 sps:$4 sm:$0xff]   ;;  %v3155_v27 = vld [vmem:[%s4648_s2 + $0xc4] ss:$8 sps:$4 sm:$0xff]   ;;  %s3379_s16 = smov 64  }
   0xe   : > { %s3480_s22 = sshll.u32 %s4659_s18, 7  ;;  %v3157_v28 = vld [vmem:[%s4648_s2 + $0xc0] ss:$8 sps:$4 sm:$0xff]   ;;  %v3158_v29 = vld [vmem:[%s4648_s2 + $0xd4] ss:$8 sps:$4 sm:$0xff]   ;;  %vm3381_vm0 = vmmov 0  }
   0xf   : > { %1217 = vmatpush1.bf16.msra.mxu0 %v3127_v5  ;;  %s3489_s27 = scalar_lea.vmem %s4646_s0, %s3480_s22  ;;  %v3160_v30 = vld [vmem:[%s4648_s2 + $0xd0] ss:$8 sps:$4 sm:$0xff]   ;;  %v3161_v31 = vld [vmem:[%s4648_s2 + $0xe4] ss:$8 sps:$4 sm:$0xff]   ;;  %v3163_v32 = vld [vmem:[%s4648_s2 + $0xe0] ss:$8 sps:$4 sm:$0xff]   ;;  %s4240_s18 = scalar_lea.vmem %s4647_s1, %s3480_s22 }
  0x10   : > { %1218 = vmatprep.subr.bf16.mxu0 %v3128_v6  ;;  %v409_v13 = vld [vmem:[%s3489_s27 + $0x8] sm:$0xff]  ;;  %v3164_v33 = vld [vmem:[%s4648_s2 + $0xf4] ss:$8 sps:$4 sm:$0xff]   ;;  %v3166_v34 = vld [vmem:[%s4648_s2 + $0xf0] ss:$8 sps:$4 sm:$0xff]   ;;  %vm1537_vm1 = vcmask 523264   ;;  %s4557_s15 = scalar_lea.vmem %s4657_s11, %s3480_s22 }
  0x11   : > { %v417_v14 = vld [vmem:[%s3489_s27 + $0x48] sm:$0xff]  ;;  %v408_v36 = vld [vmem:[%s3489_s27] sm:$0xff]  ;;  %v411_v38 = vld [vmem:[%s3489_s27 + $0x18] sm:$0xff]  ;;  %vm1852_vm2 = vcmask 130048  }
  0x12   : > { %v425_v15 = vpack.c.bf16 %v417_v14, %v409_v13  ;;  %v3169_v35 = vld [vmem:[%s4648_s2 + $0x104] ss:$8 sps:$4 sm:$0xff]   ;;  %v419_v39 = vld [vmem:[%s3489_s27 + $0x58] sm:$0xff]  ;;  %v3167_v41 = vld [vmem:[%s4648_s2 + $0x100] ss:$8 sps:$4 sm:$0xff]  }
  0x13   : > { %1219 = vmatpush1.bf16.msra.mxu0 %v3130_v7  ;;  %v416_v37 = vld [vmem:[%s3489_s27 + $0x40] sm:$0xff]  ;;  %v427_v42 = vpack.c.bf16 %v419_v39, %v411_v38  ;;  %v3172_v43 = vld [vmem:[%s4648_s2 + $0x114] ss:$8 sps:$4 sm:$0xff]   ;;  %v3170_v44 = vld [vmem:[%s4648_s2 + $0x110] ss:$8 sps:$4 sm:$0xff]  }
  0x14   : > { %1220 = vmatprep.subr.bf16.mxu0 %v3131_v8  ;;  %1244 = vmatprep.mubr.bf16.mxu0 %v425_v15  ;;  %v424_v40 = vpack.c.bf16 %v416_v37, %v408_v36  ;;  %v3175_v45 = vld [vmem:[%s4648_s2 + $0x124] ss:$8 sps:$4 sm:$0xff]   ;;  %v3173_v46 = vld [vmem:[%s4648_s2 + $0x120] ss:$8 sps:$4 sm:$0xff]   ;;  %v3178_v47 = vld [vmem:[%s4648_s2 + $0x134] ss:$8 sps:$4 sm:$0xff]  }
  0x15   : > { %v3176_v48 = vld [vmem:[%s4648_s2 + $0x130] ss:$8 sps:$4 sm:$0xff]   ;;  %v3181_v49 = vld [vmem:[%s4648_s2 + $0x144] ss:$8 sps:$4 sm:$0xff]   ;;  %v3179_v50 = vld [vmem:[%s4648_s2 + $0x140] ss:$8 sps:$4 sm:$0xff]  }
  0x16   : > { %v3184_v51 = vld [vmem:[%s4648_s2 + $0x154] ss:$8 sps:$4 sm:$0xff]   ;;  %v3182_v52 = vld [vmem:[%s4648_s2 + $0x150] ss:$8 sps:$4 sm:$0xff]   ;;  %v3187_v53 = vld [vmem:[%s4648_s2 + $0x164] ss:$8 sps:$4 sm:$0xff]  }
  0x17   : > { %1221 = vmatpush1.bf16.msra.mxu0 %v3133_v9  ;;  %v3185_v54 = vld [vmem:[%s4648_s2 + $0x160] ss:$8 sps:$4 sm:$0xff]   ;;  %v3190_v55 = vld [vmem:[%s4648_s2 + $0x174] ss:$8 sps:$4 sm:$0xff]   ;;  %v3188_v56 = vld [vmem:[%s4648_s2 + $0x170] ss:$8 sps:$4 sm:$0xff]  }
  0x18   : > { %1222 = vmatprep.subr.bf16.mxu0 %v3134_v10  ;;  %v3193_v57 = vld [vmem:[%s4648_s2 + $0x184] ss:$8 sps:$4 sm:$0xff]   ;;  %v3191_v58 = vld [vmem:[%s4648_s2 + $0x180] ss:$8 sps:$4 sm:$0xff]   ;;  %v3196_v59 = vld [vmem:[%s4648_s2 + $0x194] ss:$8 sps:$4 sm:$0xff]  }
  0x19   : > { %v3194_v60 = vld [vmem:[%s4648_s2 + $0x190] ss:$8 sps:$4 sm:$0xff]   ;;  %v3199_v61 = vld [vmem:[%s4648_s2 + $0x1a4] ss:$8 sps:$4 sm:$0xff]   ;;  %v3197_v62 = vld [vmem:[%s4648_s2 + $0x1a0] ss:$8 sps:$4 sm:$0xff]  }
  0x1a   : > { %v3202_v63 = vld [vmem:[%s4648_s2 + $0x1b4] ss:$8 sps:$4 sm:$0xff]   ;;  %v3200_v0 = vld [vmem:[%s4648_s2 + $0x1b0] ss:$8 sps:$4 sm:$0xff]   ;;  %v3205_v1 = vld [vmem:[%s4648_s2 + $0x1c4] ss:$8 sps:$4 sm:$0xff]  }
  0x1b   : > { %1223 = vmatpush1.bf16.msra.mxu0 %v3136_v11  ;;  %v3203_v2 = vld [vmem:[%s4648_s2 + $0x1c0] ss:$8 sps:$4 sm:$0xff]   ;;  %v3208_v3 = vld [vmem:[%s4648_s2 + $0x1d4] ss:$8 sps:$4 sm:$0xff]   ;;  %v3206_v4 = vld [vmem:[%s4648_s2 + $0x1d0] ss:$8 sps:$4 sm:$0xff]  }
  0x1c   : > { %1224 = vmatprep.subr.bf16.mxu0 %v3137_v12  ;;  %v3211_v5 = vld [vmem:[%s4648_s2 + $0x1e4] ss:$8 sps:$4 sm:$0xff]   ;;  %v3209_v6 = vld [vmem:[%s4648_s2 + $0x1e0] ss:$8 sps:$4 sm:$0xff]   ;;  %v3214_v7 = vld [vmem:[%s4648_s2 + $0x1f4] ss:$8 sps:$4 sm:$0xff]  }
  0x1d   : > { %v3212_v8 = vld [vmem:[%s4648_s2 + $0x1f0] ss:$8 sps:$4 sm:$0xff]   ;;  %v3217_v11 = vld [vmem:[%s4648_s2 + $0x204] ss:$8 sps:$4 sm:$0xff]   ;;  %v3215_v15 = vld [vmem:[%s4648_s2 + $0x200] ss:$8 sps:$4 sm:$0xff]  }
  0x1e   : > { %v410_v9 = vld [vmem:[%s3489_s27 + $0x10] sm:$0xff]  ;;  %v413_v12 = vld [vmem:[%s3489_s27 + $0x28] sm:$0xff]  ;;  %v3777_v39 = vld [vmem:[%s4650_s4 + $0x58] sm:$0xff] }
  0x1f   : > { %1225 = vmatpush1.bf16.msra.mxu0 %v3139_v16  ;;  %v418_v10 = vld [vmem:[%s3489_s27 + $0x50] sm:$0xff]  ;;  %v421_v13 = vld [vmem:[%s3489_s27 + $0x68] sm:$0xff] }
  0x20   : > { %1226 = vmatprep.subr.bf16.mxu0 %v3140_v17  ;;  %v426_v14 = vpack.c.bf16 %v418_v10, %v410_v9  ;;  %v429_v16 = vpack.c.bf16 %v421_v13, %v413_v12  ;;  %v3220_v17 = vld [vmem:[%s4648_s2 + $0x214] ss:$8 sps:$4 sm:$0xff]   ;;  %v3230_v36 = vld [vmem:[%s4648_s2 + $0x250] ss:$8 sps:$4 sm:$0xff]   ;;  %v3235_v37 = vld [vmem:[%s4648_s2 + $0x264] ss:$8 sps:$4 sm:$0xff]  }
  0x21   : > { %v3772_v38 = vld [vmem:[%s4650_s4 + $0x50] sm:$0xff]  ;;  %v3271_v9 = vld [vmem:[%s4648_s2 + $0x324] ss:$8 sps:$4 sm:$0xff]   ;;  %v3269_v10 = vld [vmem:[%s4648_s2 + $0x320] ss:$8 sps:$4 sm:$0xff]  }
  0x22   : > { %v3272_v12 = vld [vmem:[%s4648_s2 + $0x330] ss:$8 sps:$4 sm:$0xff]   ;;  %v3277_v13 = vld [vmem:[%s4648_s2 + $0x344] ss:$8 sps:$4 sm:$0xff]  }
  0x23   : > { %1227 = vmatpush1.bf16.msra.mxu0 %v3142_v18  ;;  %v3672_v18 = vld [vmem:[%s4650_s4] sm:$0xff] }
  0x24   : > { %1228 = vmatprep.subr.bf16.mxu0 %v3143_v19  ;;  %v3677_v19 = vld [vmem:[%s4650_s4 + $0x10] sm:$0xff]  ;;  %1416 = vrot.lane.b32.xlu0 %v3672_v18, %s3379_s16 }
  0x25   : > { %1420 = vrot.lane.b32.xlu1 %v3677_v19, %s3379_s16 }
  0x27   : > { %1229 = vmatpush1.bf16.msra.mxu0 %v3145_v20  ;;  %v3218_v20 = vld [vmem:[%s4648_s2 + $0x210] ss:$8 sps:$4 sm:$0xff]  }
  0x28   : > { %1230 = vmatprep.subr.bf16.mxu0 %v3146_v21  ;;  %v3223_v21 = vld [vmem:[%s4648_s2 + $0x224] ss:$8 sps:$4 sm:$0xff]  }
  0x2b   : > { %1231 = vmatpush1.bf16.msra.mxu0 %v3148_v22  ;;  %v3692_v22 = vld [vmem:[%s4650_s4 + $0x8] sm:$0xff] }
  0x2c   : > { %1232 = vmatprep.subr.bf16.mxu0 %v3149_v23  ;;  %v3697_v23 = vld [vmem:[%s4650_s4 + $0x18] sm:$0xff]  ;;  %1418 = vrot.lane.b32.xlu0 %v3692_v22, %s3379_s16 }
  0x2d   : > { %1422 = vrot.lane.b32.xlu1 %v3697_v23, %s3379_s16 }
  0x2f   : > { %1233 = vmatpush1.bf16.msra.mxu0 %v3151_v24  ;;  %v3221_v24 = vld [vmem:[%s4648_s2 + $0x220] ss:$8 sps:$4 sm:$0xff]  }
  0x30   : > { %1234 = vmatprep.subr.bf16.mxu0 %v3152_v25  ;;  %v3226_v25 = vld [vmem:[%s4648_s2 + $0x234] ss:$8 sps:$4 sm:$0xff]  }
  0x33   : > { %1235 = vmatpush1.bf16.msra.mxu0 %v3154_v26  ;;  %v3712_v26 = vld [vmem:[%s4650_s4 + $0x20] sm:$0xff] }
  0x34   : > { %1236 = vmatprep.subr.bf16.mxu0 %v3155_v27  ;;  %v3717_v27 = vld [vmem:[%s4650_s4 + $0x28] sm:$0xff]  ;;  %1424 = vrot.lane.b32.xlu0 %v3712_v26, %s3379_s16 }
  0x35   : > { %1426 = vrot.lane.b32.xlu1 %v3717_v27, %s3379_s16 }
  0x37   : > { %1237 = vmatpush1.bf16.msra.mxu0 %v3157_v28  ;;  %v3224_v28 = vld [vmem:[%s4648_s2 + $0x230] ss:$8 sps:$4 sm:$0xff]  }
  0x38   : > { %1238 = vmatprep.subr.bf16.mxu0 %v3158_v29  ;;  %v3229_v29 = vld [vmem:[%s4648_s2 + $0x244] ss:$8 sps:$4 sm:$0xff]  }
  0x3b   : > { %1239 = vmatpush1.bf16.msra.mxu0 %v3160_v30  ;;  %v3732_v30 = vld [vmem:[%s4650_s4 + $0x30] sm:$0xff] }
  0x3c   : > { %1240 = vmatprep.subr.bf16.mxu0 %v3161_v31  ;;  %v3737_v31 = vld [vmem:[%s4650_s4 + $0x38] sm:$0xff]  ;;  %1428 = vrot.lane.b32.xlu0 %v3732_v30, %s3379_s16 }
  0x3d   : > { %1430 = vrot.lane.b32.xlu1 %v3737_v31, %s3379_s16 }
  0x3f   : > { %1241 = vmatpush1.bf16.msra.mxu0 %v3163_v32  ;;  %v3227_v32 = vld [vmem:[%s4648_s2 + $0x240] ss:$8 sps:$4 sm:$0xff]  }
  0x40   : > { %1242 = vmatprep.subr.bf16.mxu0 %v3164_v33  ;;  %v3232_v33 = vld [vmem:[%s4648_s2 + $0x254] ss:$8 sps:$4 sm:$0xff]  }
  0x43   : > { %1243 = vmatpush1.bf16.msra.mxu0 %v3166_v34  ;;  %v3752_v34 = vld [vmem:[%s4650_s4 + $0x40] sm:$0xff] }
  0x44   : > { %1255 = vmatprep.subr.bf16.mxu0 %v3169_v35  ;;  %v3757_v35 = vld [vmem:[%s4650_s4 + $0x48] sm:$0xff]  ;;  %1432 = vrot.lane.b32.xlu0 %v3752_v34, %s3379_s16 }
  0x45   : > { %1434 = vrot.lane.b32.xlu1 %v3757_v35, %s3379_s16 }
  0x46   : > { %1245 = vmatmul.mubr.bf16.vlgmr.msra.gmra.mrb[0].mxu0 %v424_v40  ;;  %v3233_v40 = vld [vmem:[%s4648_s2 + $0x260] ss:$8 sps:$4 sm:$0xff]  }
  0x47   : > { %1256 = vmatpush1.bf16.msra.mxu0 %v3167_v41  ;;  %1287 = vmatprep.mubr.bf16.mxu0 %v427_v42  ;;  %v3238_v41 = vld [vmem:[%s4648_s2 + $0x274] ss:$8 sps:$4 sm:$0xff]   ;;  %v3792_v42 = vld [vmem:[%s4650_s4 + $0x60] sm:$0xff] }
  0x48   : > { %1257 = vmatprep.subr.bf16.mxu0 %v3172_v43  ;;  %1436 = vrot.lane.b32.xlu0 %v3772_v38, %s3379_s16  ;;  %v3797_v43 = vld [vmem:[%s4650_s4 + $0x68] sm:$0xff] }
  0x49   : > { %1438 = vrot.lane.b32.xlu1 %v3777_v39, %s3379_s16 }
  0x4b   : > { %1258 = vmatpush1.bf16.msra.mxu0 %v3170_v44  ;;  %v3236_v44 = vld [vmem:[%s4648_s2 + $0x270] ss:$8 sps:$4 sm:$0xff]  }
  0x4c   : > { %1259 = vmatprep.subr.bf16.mxu0 %v3175_v45  ;;  %v3241_v45 = vld [vmem:[%s4648_s2 + $0x284] ss:$8 sps:$4 sm:$0xff]   ;;  %1440 = vrot.lane.b32.xlu0 %v3792_v42, %s3379_s16 }
  0x4d   : > { %1442 = vrot.lane.b32.xlu1 %v3797_v43, %s3379_s16 }
  0x4f   : > { %1260 = vmatpush1.bf16.msra.mxu0 %v3173_v46  ;;  %v3812_v46 = vld [vmem:[%s4650_s4 + $0x70] sm:$0xff] }
  0x50   : > { %1261 = vmatprep.subr.bf16.mxu0 %v3178_v47  ;;  %v3817_v47 = vld [vmem:[%s4650_s4 + $0x78] sm:$0xff]  ;;  %1444 = vrot.lane.b32.xlu0 %v3812_v46, %s3379_s16 }
  0x51   : > { %1446 = vrot.lane.b32.xlu1 %v3817_v47, %s3379_s16 }
  0x53   : > { %1262 = vmatpush1.bf16.msra.mxu0 %v3176_v48  ;;  %v3239_v48 = vld [vmem:[%s4648_s2 + $0x280] ss:$8 sps:$4 sm:$0xff]  }
  0x54   : > { %1263 = vmatprep.subr.bf16.mxu0 %v3181_v49  ;;  %v3244_v49 = vld [vmem:[%s4648_s2 + $0x294] ss:$8 sps:$4 sm:$0xff]  }
  0x57   : > { %1264 = vmatpush1.bf16.msra.mxu0 %v3179_v50  ;;  %v3242_v50 = vld [vmem:[%s4648_s2 + $0x290] ss:$8 sps:$4 sm:$0xff]  }
  0x58   : > { %1265 = vmatprep.subr.bf16.mxu0 %v3184_v51  ;;  %v3247_v51 = vld [vmem:[%s4648_s2 + $0x2a4] ss:$8 sps:$4 sm:$0xff]  }
  0x5b   : > { %1266 = vmatpush1.bf16.msra.mxu0 %v3182_v52  ;;  %v3245_v52 = vld [vmem:[%s4648_s2 + $0x2a0] ss:$8 sps:$4 sm:$0xff]  }
  0x5c   : > { %1267 = vmatprep.subr.bf16.mxu0 %v3187_v53  ;;  %v3250_v53 = vld [vmem:[%s4648_s2 + $0x2b4] ss:$8 sps:$4 sm:$0xff]  }
  0x5f   : > { %1268 = vmatpush1.bf16.msra.mxu0 %v3185_v54  ;;  %v3248_v54 = vld [vmem:[%s4648_s2 + $0x2b0] ss:$8 sps:$4 sm:$0xff]  }
  0x60   : > { %1269 = vmatprep.subr.bf16.mxu0 %v3190_v55  ;;  %v3253_v55 = vld [vmem:[%s4648_s2 + $0x2c4] ss:$8 sps:$4 sm:$0xff]  }
  0x63   : > { %1270 = vmatpush1.bf16.msra.mxu0 %v3188_v56  ;;  %v3251_v56 = vld [vmem:[%s4648_s2 + $0x2c0] ss:$8 sps:$4 sm:$0xff]  }
  0x64   : > { %1271 = vmatprep.subr.bf16.mxu0 %v3193_v57  ;;  %v3256_v57 = vld [vmem:[%s4648_s2 + $0x2d4] ss:$8 sps:$4 sm:$0xff]  }
  0x67   : > { %1272 = vmatpush1.bf16.msra.mxu0 %v3191_v58  ;;  %v3254_v58 = vld [vmem:[%s4648_s2 + $0x2d0] ss:$8 sps:$4 sm:$0xff]  }
  0x68   : > { %1273 = vmatprep.subr.bf16.mxu0 %v3196_v59  ;;  %v3259_v59 = vld [vmem:[%s4648_s2 + $0x2e4] ss:$8 sps:$4 sm:$0xff]  }
  0x6b   : > { %1274 = vmatpush1.bf16.msra.mxu0 %v3194_v60  ;;  %v3257_v60 = vld [vmem:[%s4648_s2 + $0x2e0] ss:$8 sps:$4 sm:$0xff]  }
  0x6c   : > { %1275 = vmatprep.subr.bf16.mxu0 %v3199_v61  ;;  %v3262_v61 = vld [vmem:[%s4648_s2 + $0x2f4] ss:$8 sps:$4 sm:$0xff]  }
  0x6f   : > { %1276 = vmatpush1.bf16.msra.mxu0 %v3197_v62  ;;  %v3260_v62 = vld [vmem:[%s4648_s2 + $0x2f0] ss:$8 sps:$4 sm:$0xff]  }
  0x70   : > { %1277 = vmatprep.subr.bf16.mxu0 %v3202_v63  ;;  %v412_v63 = vld [vmem:[%s3489_s27 + $0x20] sm:$0xff] }
  0x73   : > { %1278 = vmatpush1.bf16.msra.mxu0 %v3200_v0  ;;  %v420_v0 = vld [vmem:[%s3489_s27 + $0x60] sm:$0xff] }
  0x74   : > { %1279 = vmatprep.subr.bf16.mxu0 %v3205_v1  ;;  %v3265_v1 = vld [vmem:[%s4648_s2 + $0x304] ss:$8 sps:$4 sm:$0xff]  }
  0x77   : > { %1280 = vmatpush1.bf16.msra.mxu0 %v3203_v2  ;;  %v415_v2 = vld [vmem:[%s3489_s27 + $0x38] sm:$0xff] }
  0x78   : > { %1281 = vmatprep.subr.bf16.mxu0 %v3208_v3  ;;  %v423_v3 = vld [vmem:[%s3489_s27 + $0x78] sm:$0xff] }
  0x7b   : > { %1282 = vmatpush1.bf16.msra.mxu0 %v3206_v4  ;;  %v428_v4 = vpack.c.bf16 %v420_v0, %v412_v63 }
  0x7c   : > { %1283 = vmatprep.subr.bf16.mxu0 %v3211_v5  ;;  %v3263_v5 = vld [vmem:[%s4648_s2 + $0x300] ss:$8 sps:$4 sm:$0xff]  }
  0x7f   : > { %1284 = vmatpush1.bf16.msra.mxu0 %v3209_v6  ;;  %v431_v6 = vpack.c.bf16 %v423_v3, %v415_v2  ;;  %v562_v2 = vlaneseq }
  0x80   : > { %1285 = vmatprep.subr.bf16.mxu0 %v3214_v7  ;;  %v3268_v7 = vld [vmem:[%s4648_s2 + $0x314] ss:$8 sps:$4 sm:$0xff]  }
  0x83   : > { %1286 = vmatpush1.bf16.msra.mxu0 %v3212_v8  ;;  %v3266_v8 = vld [vmem:[%s4648_s2 + $0x310] ss:$8 sps:$4 sm:$0xff]  }
  0x84   : > { %1298 = vmatprep.subr.bf16.mxu0 %v3217_v11  ;;  %v3274_v11 = vld [vmem:[%s4648_s2 + $0x334] ss:$8 sps:$4 sm:$0xff]  }
  0x86   : > { %1288 = vmatmul.mubr.bf16.vlgmr.msra.gmra.mrb[0].mxu0 %v426_v14  ;;  %v3275_v14 = vld [vmem:[%s4648_s2 + $0x340] ss:$8 sps:$4 sm:$0xff]  }
  0x87   : > { %1299 = vmatpush1.bf16.msra.mxu0 %v3215_v15  ;;  %1330 = vmatprep.mubr.bf16.mxu0 %v429_v16  ;;  %v3280_v15 = vld [vmem:[%s4648_s2 + $0x354] ss:$8 sps:$4 sm:$0xff]   ;;  %v3278_v16 = vld [vmem:[%s4648_s2 + $0x350] ss:$8 sps:$4 sm:$0xff]  }
  0x88   : > { %1300 = vmatprep.subr.bf16.mxu0 %v3220_v17  ;;  %v3283_v17 = vld [vmem:[%s4648_s2 + $0x364] ss:$8 sps:$4 sm:$0xff]  }
  0x8b   : > { %1301 = vmatpush1.bf16.msra.mxu0 %v3218_v20  ;;  %v3281_v20 = vld [vmem:[%s4648_s2 + $0x360] ss:$8 sps:$4 sm:$0xff]  }
  0x8c   : > { %1302 = vmatprep.subr.bf16.mxu0 %v3223_v21  ;;  %v3286_v21 = vld [vmem:[%s4648_s2 + $0x374] ss:$8 sps:$4 sm:$0xff]  }
  0x8f   : > { %1303 = vmatpush1.bf16.msra.mxu0 %v3221_v24  ;;  %v3284_v24 = vld [vmem:[%s4648_s2 + $0x370] ss:$8 sps:$4 sm:$0xff]  }
  0x90   : > { %1304 = vmatprep.subr.bf16.mxu0 %v3226_v25  ;;  %v3289_v25 = vld [vmem:[%s4648_s2 + $0x384] ss:$8 sps:$4 sm:$0xff]  }
  0x93   : > { %1305 = vmatpush1.bf16.msra.mxu0 %v3224_v28  ;;  %v3287_v28 = vld [vmem:[%s4648_s2 + $0x380] ss:$8 sps:$4 sm:$0xff]  }
  0x94   : > { %1306 = vmatprep.subr.bf16.mxu0 %v3229_v29  ;;  %v3292_v29 = vld [vmem:[%s4648_s2 + $0x394] ss:$8 sps:$4 sm:$0xff]  }
  0x97   : > { %1307 = vmatpush1.bf16.msra.mxu0 %v3227_v32  ;;  %v3290_v32 = vld [vmem:[%s4648_s2 + $0x390] ss:$8 sps:$4 sm:$0xff]  }
  0x98   : > { %1308 = vmatprep.subr.bf16.mxu0 %v3232_v33  ;;  %v3295_v33 = vld [vmem:[%s4648_s2 + $0x3a4] ss:$8 sps:$4 sm:$0xff]  }
  0x9b   : > { %1309 = vmatpush1.bf16.msra.mxu0 %v3230_v36  ;;  %v3293_v36 = vld [vmem:[%s4648_s2 + $0x3a0] ss:$8 sps:$4 sm:$0xff]  }
  0x9c   : > { %1310 = vmatprep.subr.bf16.mxu0 %v3235_v37  ;;  %v3298_v37 = vld [vmem:[%s4648_s2 + $0x3b4] ss:$8 sps:$4 sm:$0xff]  }
  0x9f   : > { %1311 = vmatpush1.bf16.msra.mxu0 %v3233_v40  ;;  %v3296_v40 = vld [vmem:[%s4648_s2 + $0x3b0] ss:$8 sps:$4 sm:$0xff]  }
  0xa0   : > { %1312 = vmatprep.subr.bf16.mxu0 %v3238_v41  ;;  %v3301_v41 = vld [vmem:[%s4648_s2 + $0x3c4] ss:$8 sps:$4 sm:$0xff]  }
  0xa3   : > { %1313 = vmatpush1.bf16.msra.mxu0 %v3236_v44  ;;  %v3299_v44 = vld [vmem:[%s4648_s2 + $0x3c0] ss:$8 sps:$4 sm:$0xff]  }
  0xa4   : > { %1314 = vmatprep.subr.bf16.mxu0 %v3241_v45  ;;  %v3304_v45 = vld [vmem:[%s4648_s2 + $0x3d4] ss:$8 sps:$4 sm:$0xff]  }
  0xa7   : > { %1315 = vmatpush1.bf16.msra.mxu0 %v3239_v48  ;;  %v3302_v48 = vld [vmem:[%s4648_s2 + $0x3d0] ss:$8 sps:$4 sm:$0xff]  }
  0xa8   : > { %1316 = vmatprep.subr.bf16.mxu0 %v3244_v49  ;;  %v3307_v49 = vld [vmem:[%s4648_s2 + $0x3e4] ss:$8 sps:$4 sm:$0xff]  }
  0xab   : > { %1317 = vmatpush1.bf16.msra.mxu0 %v3242_v50  ;;  %v3305_v50 = vld [vmem:[%s4648_s2 + $0x3e0] ss:$8 sps:$4 sm:$0xff]  }
  0xac   : > { %1318 = vmatprep.subr.bf16.mxu0 %v3247_v51  ;;  %v3310_v51 = vld [vmem:[%s4648_s2 + $0x3f4] ss:$8 sps:$4 sm:$0xff]  }
  0xaf   : > { %1319 = vmatpush1.bf16.msra.mxu0 %v3245_v52  ;;  %v3308_v52 = vld [vmem:[%s4648_s2 + $0x3f0] ss:$8 sps:$4 sm:$0xff]  }
  0xb0   : > { %1320 = vmatprep.subr.bf16.mxu0 %v3250_v53  ;;  %v414_v53 = vld [vmem:[%s3489_s27 + $0x30] sm:$0xff] }
  0xb3   : > { %1321 = vmatpush1.bf16.msra.mxu0 %v3248_v54  ;;  %v422_v54 = vld [vmem:[%s3489_s27 + $0x70] sm:$0xff] }
  0xb4   : > { %1322 = vmatprep.subr.bf16.mxu0 %v3253_v55  ;;  %v430_v55 = vpack.c.bf16 %v422_v54, %v414_v53 }
  0xb7   : > { %1323 = vmatpush1.bf16.msra.mxu0 %v3251_v56  ;;  %v1417_v56 = vpop.permute.xlu0 %1416 }
  0xb8   : > { %1324 = vmatprep.subr.bf16.mxu0 %v3256_v57  ;;  %v1421_v57 = vpop.permute.xlu1 %1420 }
  0xbb   : > { %1325 = vmatpush1.bf16.msra.mxu0 %v3254_v58  ;;  %v1419_v58 = vpop.permute.xlu0 %1418 }
  0xbc   : > { %1326 = vmatprep.subr.bf16.mxu0 %v3259_v59  ;;  %v1423_v59 = vpop.permute.xlu1 %1422 }
  0xbf   : > { %1327 = vmatpush1.bf16.msra.mxu0 %v3257_v60  ;;  %v1425_v60 = vpop.permute.xlu0 %1424 }
  0xc0   : > { %1328 = vmatprep.subr.bf16.mxu0 %v3262_v61  ;;  %v1427_v61 = vpop.permute.xlu1 %1426 }
  0xc3   : > { %1329 = vmatpush1.bf16.msra.mxu0 %v3260_v62  ;;  %v1429_v62 = vpop.permute.xlu0 %1428 }
  0xc4   : > { %1341 = vmatprep.subr.bf16.mxu0 %v3265_v1  ;;  %v1431_v63 = vpop.permute.xlu1 %1430 }
  0xc6   : > { %1331 = vmatmul.mubr.bf16.vlgmr.msra.gmra.mrb[0].mxu0 %v428_v4  ;;  %v563_v4 = vshrl.u32 %v562_v2, 7 }
  0xc7   : > { %1342 = vmatpush1.bf16.msra.mxu0 %v3263_v5  ;;  %1373 = vmatprep.mubr.bf16.mxu0 %v431_v6  ;;  %v1433_v0 = vpop.permute.xlu0 %1432 }
  0xc8   : > { %1343 = vmatprep.subr.bf16.mxu0 %v3268_v7  ;;  %v1435_v1 = vpop.permute.xlu1 %1434  ;;  %v564_v6 = vsub.s32 0, %v563_v4 }
  0xcb   : > { %1344 = vmatpush1.bf16.msra.mxu0 %v3266_v8  ;;  %v1437_v3 = vpop.permute.xlu0 %1436  ;;  %v560_v8 = vld [vmem:[%s4649_s3] sm:$0x3] }
  0xcc   : > { %1345 = vmatprep.subr.bf16.mxu0 %v3271_v9  ;;  %v1439_v5 = vpop.permute.xlu1 %1438  ;;  %v568_v9 = vsub.s32 1, %v563_v4 }
  0xcf   : > { %1346 = vmatpush1.bf16.msra.mxu0 %v3269_v10  ;;  %v1441_v7 = vpop.permute.xlu0 %1440 }
  0xd0   : > { %1347 = vmatprep.subr.bf16.mxu0 %v3274_v11  ;;  %v1443_v10 = vpop.permute.xlu1 %1442  ;;  %v565_v11 = vrot.slane %v560_v8, %v564_v6 }
  0xd3   : > { %1348 = vmatpush1.bf16.msra.mxu0 %v3272_v12  ;;  %v3380_v12 = vmov 0.0  }
  0xd4   : > { %1349 = vmatprep.subr.bf16.mxu0 %v3277_v13  ;;  %2984 = vmatprep.subr.bf16.mxu1 %v3380_v12  ;;  %v569_v13 = vrot.slane %v560_v8, %v568_v9 }
  0xd5   : > { %3000 = vmatprep.mubr.msk.bf16.mxu1 %vm3381_vm0, %v3380_v12 }
  0xd7   : > { %1350 = vmatpush1.bf16.msra.mxu0 %v3275_v14 }
  0xd8   : > { %1351 = vmatprep.subr.bf16.mxu0 %v3280_v15  ;;  %v1445_v15 = vpop.permute.xlu0 %1444 }
  0xdb   : > { %1352 = vmatpush1.bf16.msra.mxu0 %v3278_v16 }
  0xdc   : > { %1353 = vmatprep.subr.bf16.mxu0 %v3283_v17 }
  0xdf   : > { %1354 = vmatpush1.bf16.msra.mxu0 %v3281_v20 }
  0xe0   : > { %1355 = vmatprep.subr.bf16.mxu0 %v3286_v21 }
  0xe3   : > { %1356 = vmatpush1.bf16.msra.mxu0 %v3284_v24  ;;  %v1447_v24 = vpop.permute.xlu1 %1446 }
  0xe4   : > { %1357 = vmatprep.subr.bf16.mxu0 %v3289_v25 }
  0xe7   : > { %1358 = vmatpush1.bf16.msra.mxu0 %v3287_v28 }
  0xe8   : > { %1359 = vmatprep.subr.bf16.mxu0 %v3292_v29 }
  0xeb   : > { %1360 = vmatpush1.bf16.msra.mxu0 %v3290_v32 }
  0xec   : > { %1361 = vmatprep.subr.bf16.mxu0 %v3295_v33 }
  0xef   : > { %1362 = vmatpush1.bf16.msra.mxu0 %v3293_v36 }
  0xf0   : > { %1363 = vmatprep.subr.bf16.mxu0 %v3298_v37 }
  0xf3   : > { %1364 = vmatpush1.bf16.msra.mxu0 %v3296_v40 }
  0xf4   : > { %1365 = vmatprep.subr.bf16.mxu0 %v3301_v41 }
  0xf7   : > { %1366 = vmatpush1.bf16.msra.mxu0 %v3299_v44 }
  0xf8   : > { %1367 = vmatprep.subr.bf16.mxu0 %v3304_v45 }
  0xfb   : > { %1368 = vmatpush1.bf16.msra.mxu0 %v3302_v48 }
  0xfc   : > { %1369 = vmatprep.subr.bf16.mxu0 %v3307_v49 }
  0xff   : > { %1370 = vmatpush1.bf16.msra.mxu0 %v3305_v50 }
 0x100   : > { %1371 = vmatprep.subr.bf16.mxu0 %v3310_v51 }
 0x103   : > { %1372 = vmatpush1.bf16.msra.mxu0 %v3308_v52 }
 0x106   : > { %1374 = vmatmul.mubr.bf16.vlgmr.msra.gmra.mrb[0].mxu0 %v430_v55 }
 0x1d9   : > { %v1375_v14 = vpop.f32.mrb[0].mxu0 }
 0x1da   : > { %v3975_v16 = vadd.f32 %v1375_v14, %v565_v11  ;;  %v1377_v17 = vpop.f32.mrb[1].mxu0 }
 0x1db   : > { %v3093_v20 = vadd.f32 %v1377_v17, %v569_v13  ;;  %v1379_v21 = vpop.f32.mrb[2].mxu0 }
 0x1dc   : > { %v1478_v25 = vmul.f32 %v3975_v16, %v1445_v15  ;;  %v3978_v28 = vadd.f32 %v1379_v21, %v565_v11  ;;  %v1381_v29 = vpop.f32.mrb[3].mxu0  ;;  %v1466_v32 = vmul.f32 %v3975_v16, %v1421_v57  ;;  %v1464_v33 = vmul.f32 %v3975_v16, %v1417_v56 }
 0x1dd   : > { %v3095_v36 = vadd.f32 %v1381_v29, %v569_v13  ;;  %v1470_v37 = vmul.f32 %v3975_v16, %v1429_v62  ;;  %v1468_v40 = vmul.f32 %v3975_v16, %v1425_v60  ;;  %v1474_v41 = vmul.f32 %v3975_v16, %v1437_v3 }
 0x1de   : > { %v1479_v44 = vmul.f32 %v3978_v28, %v1447_v24  ;;  %v1467_v45 = vmul.f32 %v3978_v28, %v1423_v59  ;;  %v1465_v48 = vmul.f32 %v3978_v28, %v1419_v58  ;;  %v1471_v49 = vmul.f32 %v3978_v28, %v1431_v63 }
 0x1df   : > { %v1469_v50 = vmul.f32 %v3978_v28, %v1427_v61  ;;  %v1475_v51 = vmul.f32 %v3978_v28, %v1439_v5  ;;  %v1472_v52 = vmul.f32 %v3975_v16, %v1433_v0  ;;  %v1473_v53 = vmul.f32 %v3978_v28, %v1435_v1 }
 0x1e0   : > { %v1487_v54 = vpack.c.bf16 %v1479_v44, %v1478_v25  ;;  %v1481_v55 = vpack.c.bf16 %v1467_v45, %v1466_v32  ;;  %v1480_v56 = vpack.c.bf16 %v1465_v48, %v1464_v33  ;;  %v1483_v57 = vpack.c.bf16 %v1471_v49, %v1470_v37 }
 0x1e1   : > { %v1482_v60 = vpack.c.bf16 %v1469_v50, %v1468_v40  ;;  %v1485_v62 = vpack.c.bf16 %v1475_v51, %v1474_v41  ;;  %v1484_v3 = vpack.c.bf16 %v1473_v53, %v1472_v52  ;;  %v1476_v59 = vmul.f32 %v3975_v16, %v1441_v7 }
 0x1e2   : > { %1523 = vrot.lane.b32.xlu1 %v1481_v55, %s3379_s16  ;;  %1521 = vrot.lane.b32.xlu0 %v1480_v56, %s3379_s16  ;;  %v1477_v58 = vmul.f32 %v3978_v28, %v1443_v10  ;;  %v1512_v61 = vpack.c.bf16 %v3978_v28, %v3975_v16  ;;  %v4000_v63 = vmul.f32 %v3093_v20, %v3672_v18 }
 0x1e3   : > { %v4003_v0 = vmul.f32 %v3095_v36, %v3692_v22  ;;  %v4006_v1 = vmul.f32 %v3093_v20, %v3677_v19  ;;  %v4009_v4 = vmul.f32 %v3095_v36, %v3697_v23  ;;  %v4012_v5 = vmul.f32 %v3093_v20, %v3712_v26 }
 0x1e4   : > { %v1486_v6 = vpack.c.bf16 %v1477_v58, %v1476_v59  ;;  %v4015_v7 = vmul.f32 %v3095_v36, %v3717_v27  ;;  %v4018_v8 = vmul.f32 %v3093_v20, %v3732_v30  ;;  %v4021_v9 = vmul.f32 %v3095_v36, %v3737_v31 }
 0x1e5   : > { %v1504_v10 = vpack.c.bf16 %v4003_v0, %v4000_v63  ;;  %v1505_v11 = vpack.c.bf16 %v4009_v4, %v4006_v1  ;;  %v4028_v13 = vmul.f32 %v3093_v20, %v3752_v34  ;;  %v4031_v14 = vmul.f32 %v3095_v36, %v3757_v35 }
 0x1e6   : > { %1527 = vrot.lane.b32.xlu1 %v1483_v57, %s3379_s16  ;;  %1525 = vrot.lane.b32.xlu0 %v1482_v60, %s3379_s16  ;;  %v1506_v15 = vpack.c.bf16 %v4015_v7, %v4012_v5  ;;  %v1507_v17 = vpack.c.bf16 %v4021_v9, %v4018_v8  ;;  %v1498_v21 = vmul.f32 %v3093_v20, %v3772_v38 }
 0x1e7   : > { %v1508_v24 = vpack.c.bf16 %v4031_v14, %v4028_v13  ;;  %v1499_v25 = vmul.f32 %v3095_v36, %v3777_v39  ;;  %v1500_v29 = vmul.f32 %v3093_v20, %v3792_v42  ;;  %v1501_v32 = vmul.f32 %v3095_v36, %v3797_v43 }
 0x1e8   : > { %v1502_v33 = vmul.f32 %v3093_v20, %v3812_v46  ;;  %v1503_v37 = vmul.f32 %v3095_v36, %v3817_v47  ;;  %v1658_v8 = vpack.c.bf16 %v3692_v22, %v3672_v18  ;;  %v1661_v18 = vpack.c.bf16 %v3737_v31, %v3732_v30  ;;  %v3312_v30 = vld [vmem:[%s4651_s5 + $0x8] sm:$0xff]   ;;  %v3313_v31 = vld [vmem:[%s4651_s5 + $0x10] sm:$0xff]  }
 0x1e9   : > { %v1509_v40 = vpack.c.bf16 %v1499_v25, %v1498_v21  ;;  %v1510_v41 = vpack.c.bf16 %v1501_v32, %v1500_v29  ;;  %v1663_v22 = vpack.c.bf16 %v3777_v39, %v3772_v38  ;;  %v2889_v25 = vld [vmem:[%s4652_s6] ss:$0 sm:$0xff] }
 0x1ea   : > { %1531 = vrot.lane.b32.xlu1 %v1485_v62, %s3379_s16  ;;  %1529 = vrot.lane.b32.xlu0 %v1484_v3, %s3379_s16  ;;  %v1511_v44 = vpack.c.bf16 %v1503_v37, %v1502_v33 }
 0x1ee   : > { %1535 = vrot.lane.b32.xlu1 %v1487_v54, %s3379_s16  ;;  %1533 = vrot.lane.b32.xlu0 %v1486_v6, %s3379_s16 }
 0x254   : > { %v1522_v45 = vpop.permute.xlu0 %1521  ;;  %v1524_v36 = vpop.permute.xlu1 %1523 }
 0x255   : > { %v1542_v20 = vsel %vm1537_vm1, %v1522_v45, 0  ;;  %v1545_v48 = vsel %vm1537_vm1, %v1524_v36, 0  ;;  %v3316_v45 = vld [vmem:[%s4653_s7 + $0x8] sm:$0xff]   ;;  %v3318_v36 = vld [vmem:[%s4653_s7 + $0x18] sm:$0xff]  }
 0x256   : > { %2985 = vmatpush3.bf16.xpose.msra.mxu1 %v1542_v20  ;;  %v3317_v20 = vld [vmem:[%s4653_s7 + $0x10] sm:$0xff]  }
 0x257   : > { %2986 = vmatprep.subr.bf16.mxu1 %v3380_v12 }
 0x258   : > { %v1526_v49 = vpop.permute.xlu0 %1525  ;;  %v1528_v51 = vpop.permute.xlu1 %1527 }
 0x259   : > { %v1548_v50 = vsel %vm1537_vm1, %v1526_v49, 0  ;;  %v1551_v52 = vsel %vm1537_vm1, %v1528_v51, 0  ;;  %v3320_v49 = vld [vmem:[%s4653_s7 + $0x28] sm:$0xff]   ;;  %v3322_v51 = vld [vmem:[%s4653_s7 + $0x38] sm:$0xff]  }
 0x25c   : > { %v1530_v53 = vpop.permute.xlu0 %1529  ;;  %v1532_v55 = vpop.permute.xlu1 %1531 }
 0x25d   : > { %v1554_v54 = vsel %vm1537_vm1, %v1530_v53, 0  ;;  %v1557_v56 = vsel %vm1537_vm1, %v1532_v55, 0  ;;  %v3324_v53 = vld [vmem:[%s4654_s8 + $0x8] sm:$0xff]   ;;  %v3326_v55 = vld [vmem:[%s4654_s8 + $0x18] sm:$0xff]  }
 0x25e   : > { %2987 = vmatpush3.bf16.xpose.msra.mxu1 %v1545_v48  ;;  %v3319_v48 = vld [vmem:[%s4653_s7 + $0x20] sm:$0xff]  }
 0x25f   : > { %2988 = vmatprep.subr.bf16.mxu1 %v3380_v12 }
 0x260   : > { %v1534_v57 = vpop.permute.xlu0 %1533  ;;  %v1536_v62 = vpop.permute.xlu1 %1535 }
 0x261   : > { %v1560_v60 = vsel %vm1537_vm1, %v1534_v57, 0  ;;  %v1563_v3 = vsel %vm1537_vm1, %v1536_v62, 0  ;;  %v3328_v57 = vld [vmem:[%s4654_s8 + $0x28] sm:$0xff]   ;;  %v3330_v62 = vld [vmem:[%s4654_s8 + $0x38] sm:$0xff]  }
 0x266   : > { %2989 = vmatpush3.bf16.xpose.msra.mxu1 %v1548_v50  ;;  %v3321_v50 = vld [vmem:[%s4653_s7 + $0x30] sm:$0xff]  }
 0x267   : > { %2990 = vmatprep.subr.bf16.mxu1 %v3380_v12 }
 0x26e   : > { %2991 = vmatpush3.bf16.xpose.msra.mxu1 %v1551_v52  ;;  %v3323_v52 = vld [vmem:[%s4654_s8] sm:$0xff]  }
 0x26f   : > { %2992 = vmatprep.subr.bf16.mxu1 %v3380_v12 }
 0x276   : > { %2993 = vmatpush3.bf16.xpose.msra.mxu1 %v1554_v54  ;;  %v3325_v54 = vld [vmem:[%s4654_s8 + $0x10] sm:$0xff]  }
 0x277   : > { %2994 = vmatprep.subr.bf16.mxu1 %v3380_v12 }
 0x27e   : > { %2995 = vmatpush3.bf16.xpose.msra.mxu1 %v1557_v56  ;;  %v3327_v56 = vld [vmem:[%s4654_s8 + $0x20] sm:$0xff]  }
 0x27f   : > { %2996 = vmatprep.subr.bf16.mxu1 %v3380_v12 }
 0x286   : > { %2997 = vmatpush3.bf16.xpose.msra.mxu1 %v1560_v60  ;;  %v3329_v60 = vld [vmem:[%s4654_s8 + $0x30] sm:$0xff]  }
 0x287   : > { %2998 = vmatprep.subr.bf16.mxu1 %v3380_v12 }
 0x28e   : > { %2999 = vmatpush3.bf16.xpose.msra.mxu1 %v1563_v3 }
 0x28f   : > { %3004 = vmatprep.subr.bf16.mxu1 %v3380_v12 }
 0x295   : > { %3001 = vmatmul.mubr.msk.bf16.vlgmr.msra.gmra.mrb[0].mxu1 %vm1537_vm1, %v1512_v61 }
 0x296   : > { %3005 = vmatpush3.bf16.msra.mxu1 %v1504_v10  ;;  %3020 = vmatprep.mubr.msk.bf16.mxu1 %vm3381_vm0, %v3380_v12  ;;  %v1659_v10 = vpack.c.bf16 %v3697_v23, %v3677_v19  ;;  %v1662_v19 = vpack.c.bf16 %v3757_v35, %v3752_v34  ;;  %v1664_v23 = vpack.c.bf16 %v3797_v43, %v3792_v42  ;;  %v3314_v34 = vld [vmem:[%s4651_s5 + $0x18] sm:$0xff]  }
 0x297   : > { %3006 = vmatprep.subr.bf16.mxu1 %v3380_v12 }
 0x29a   : > { %3007 = vmatpush3.bf16.msra.mxu1 %v1505_v11  ;;  %v1660_v11 = vpack.c.bf16 %v3717_v27, %v3712_v26  ;;  %v1665_v26 = vpack.c.bf16 %v3817_v47, %v3812_v46  ;;  %v3311_v27 = vld [vmem:[%s4651_s5] sm:$0xff]  }
 0x29b   : > { %3008 = vmatprep.subr.bf16.mxu1 %v3380_v12 }
 0x29e   : > { %3009 = vmatpush3.bf16.msra.mxu1 %v1506_v15 }
 0x29f   : > { %3010 = vmatprep.subr.bf16.mxu1 %v3380_v12 }
 0x2a2   : > { %3011 = vmatpush3.bf16.msra.mxu1 %v1507_v17 }
 0x2a3   : > { %3012 = vmatprep.subr.bf16.mxu1 %v3380_v12 }
 0x2a6   : > { %3013 = vmatpush3.bf16.msra.mxu1 %v1508_v24 }
 0x2a7   : > { %3014 = vmatprep.subr.bf16.mxu1 %v3380_v12 }
 0x2aa   : > { %3015 = vmatpush3.bf16.msra.mxu1 %v1509_v40 }
 0x2ab   : > { %3016 = vmatprep.subr.bf16.mxu1 %v3380_v12 }
 0x2ae   : > { %3017 = vmatpush3.bf16.msra.mxu1 %v1510_v41 }
 0x2af   : > { %3018 = vmatprep.subr.bf16.mxu1 %v3380_v12 }
 0x2b2   : > { %3019 = vmatpush3.bf16.msra.mxu1 %v1511_v44 }
 0x2b3   : > { %3024 = vmatprep.subr.bf16.mxu1 %v3380_v12 }
 0x368   : > { %v1599_v16 = vpop.f32.mrb[0].mxu1 }
 0x369   : > { %1606 = vmax.xlane.f32.xlu0 %v1599_v16  ;;  %v3002_v28 = vpop.f32.mrb[1].mxu1 }
 0x36a   : > { %v1602_v59 = vpop.f32.mrb[2].mxu1 }
 0x36b   : > { %1608 = vmax.xlane.f32.xlu1 %v1602_v59  ;;  %v3003_v58 = vpop.f32.mrb[3].mxu1 }
 0x3f6   : > { %v1607_v61 = vpop.xlane.xlu0 %1606 }
 0x3f7   : > { %v1610_v63 = vsub.f32 %v1599_v16, %v1607_v61 }
 0x3f8   : > { %v1609_v0 = vpop.xlane.xlu1 %1608 }
 0x3f9   : > { %v1612_v1 = vmul.f32 1.442695, %v1610_v63  ;;  %v1611_v4 = vsub.f32 %v1602_v59, %v1609_v0 }
 0x3fb   : > { %v1614_v5 = vmul.f32 1.442695, %v1611_v4  ;;  %3331 = vpow2.f32 %v1612_v1 }
 0x3fd   : > { %3333 = vpow2.f32 %v1614_v5 }
 0x405   : > { %v3332_v6 = vpop.eup %3331 }
 0x407   : > { %v3334_v7 = vpop.eup %3333 }
 0x408   : > { %v1616_v9 = vpack.c.bf16 %v3334_v7, %v3332_v6 }
 0x40a   : > { %3021 = vmatmul.mubr.bf16.vlgmr.msra.gmra.mrb[4].mxu1 %v1616_v9 }
 0x40b   : > { %3025 = vmatpush3.bf16.msra.mxu1 %v1658_v8  ;;  %3040 = vmatprep.mubr.msk.bf16.mxu1 %vm3381_vm0, %v3380_v12 }
 0x40c   : > { %3026 = vmatprep.subr.bf16.mxu1 %v3380_v12 }
 0x40f   : > { %3027 = vmatpush3.bf16.msra.mxu1 %v1659_v10 }
 0x410   : > { %3028 = vmatprep.subr.bf16.mxu1 %v3380_v12 }
 0x413   : > { %3029 = vmatpush3.bf16.msra.mxu1 %v1660_v11 }
 0x414   : > { %3030 = vmatprep.subr.bf16.mxu1 %v3380_v12 }
 0x417   : > { %3031 = vmatpush3.bf16.msra.mxu1 %v1661_v18 }
 0x418   : > { %3032 = vmatprep.subr.bf16.mxu1 %v3380_v12 }
 0x41b   : > { %3033 = vmatpush3.bf16.msra.mxu1 %v1662_v19 }
 0x41c   : > { %3034 = vmatprep.subr.bf16.mxu1 %v3380_v12 }
 0x41f   : > { %3035 = vmatpush3.bf16.msra.mxu1 %v1663_v22 }
 0x420   : > { %3036 = vmatprep.subr.bf16.mxu1 %v3380_v12 }
 0x423   : > { %3037 = vmatpush3.bf16.msra.mxu1 %v1664_v23 }
 0x424   : > { %3038 = vmatprep.subr.bf16.mxu1 %v3380_v12 }
 0x427   : > { %3039 = vmatpush3.bf16.msra.mxu1 %v1665_v26 }
 0x428   : > { %3044 = vmatprep.subr.bf16.mxu1 %v3380_v12 }
 0x42a   : > { %3041 = vmatmul.mubr.bf16.vlgmr.msra.gmra.mrb[8].mxu1 %v1616_v9 }
 0x42b   : > { %3052 = vmatprep.mubr.msk.bf16.mxu1 %vm3381_vm0, %v3380_v12  ;;  %3045 = vmatpush3.bf16.msra.mxu1 %v3311_v27 }
 0x42c   : > { %3046 = vmatprep.subr.bf16.mxu1 %v3380_v12 }
 0x42f   : > { %3047 = vmatpush3.bf16.msra.mxu1 %v3312_v30 }
 0x430   : > { %3048 = vmatprep.subr.bf16.mxu1 %v3380_v12 }
 0x433   : > { %3049 = vmatpush3.bf16.msra.mxu1 %v3313_v31 }
 0x434   : > { %3050 = vmatprep.subr.bf16.mxu1 %v3380_v12  ;;  %v3315_v12 = vld [vmem:[%s4653_s7] sm:$0xff]  }
 0x437   : > { %3051 = vmatpush3.bf16.msra.mxu1 %v3314_v34 }
 0x4dd   : > { %v1651_v35 = vpop.f32.mrb[4].mxu1 }
 0x4de   : > { %v3022_v38 = vpop.f32.mrb[5].mxu1 }
 0x4df   : > { %v1654_v39 = vpop.f32.mrb[6].mxu1 }
 0x4e0   : > { %v3023_v42 = vpop.f32.mrb[7].mxu1 }
 0x4fd   : > { %v1700_v43 = vpop.f32.mrb[8].mxu1 }
 0x4fe   : > { %3335 = vrcp.f32 %v1700_v43  ;;  %v3042_v46 = vpop.f32.mrb[9].mxu1 }
 0x4ff   : > { %v1703_v47 = vpop.f32.mrb[10].mxu1 }
 0x500   : > { %3337 = vrcp.f32 %v1703_v47  ;;  %v3043_v13 = vpop.f32.mrb[11].mxu1  ;;  %v4243_v47 = vand.u32 127, %v562_v2 }
 0x501   : > { %v2233_v13 = vld [vmem:[%s4240_s18 + $0x10] sm:$0xff] }
 0x502   : > { %vm2265_vm3 = vcmp.lt.s32.totalorder %v4243_v47, 64 }
 0x508   : > { %v3336_v14 = vpop.eup %3335 }
 0x509   : > { %v1709_v15 = vmul.f32 %v3336_v14, %v1651_v35 }
 0x50a   : > { %v3338_v17 = vpop.eup %3337 }
 0x50b   : > { %v1710_v21 = vmul.f32 %v3338_v17, %v1654_v39 }
 0x50d   : > { %v1711_v24 = vpack.c.bf16 %v1710_v21, %v1709_v15 }
 0x50f   : > { %3053 = vmatmul.mubr.msk.bf16.vlgmr.msra.gmra.mrb[12].mxu1 %vm1537_vm1, %v1711_v24  ;;  %v2231_v24 = vld [vmem:[%s4240_s18] sm:$0xff] }
 0x510   : > { %3058 = vmatprep.mubr.msk.bf16.mxu1 %vm1852_vm2, %v3315_v12 }
 0x5e2   : > { %v1788_v29 = vpop.f32.mrb[12].mxu1 }
 0x5e3   : > { %v3054_v32 = vpop.f32.mrb[13].mxu1  ;;  %v1789_v37 = vadd.f32 %v2889_v25, %v1788_v29  ;;  %v2234_v29 = vld [vmem:[%s4240_s18 + $0x18] sm:$0xff] }
 0x5e4   : > { %v1791_v33 = vpop.f32.mrb[14].mxu1 }
 0x5e5   : > { %v1792_v40 = vadd.f32 %v2889_v25, %v1791_v33  ;;  %v3055_v41 = vpop.f32.mrb[15].mxu1  ;;  %v2232_v33 = vld [vmem:[%s4240_s18 + $0x8] sm:$0xff] }
 0x5e7   : > { %v1795_v44 = vpack.c.bf16 %v1792_v40, %v1789_v37 }
 0x5e9   : > { %3056 = vmatprep.subr.bf16.mxu1 %v1795_v44 }
 0x5ea   : > { %3057 = vmatpush3.bf16.msra.mxu1 %v1795_v44 }
 0x5eb   : > { %3074 = vmatprep.subr.bf16.mxu1 %v1795_v44 }
 0x5ed   : > { %3059 = vmatmul.mubr.msk.bf16.vlgmr.msra.gmra.mrb[16].mxu1 %vm1852_vm2, %v3316_v45 }
 0x5ee   : > { %3075 = vmatpush3.bf16.msra.mxu1 %v1795_v44  ;;  %3062 = vmatprep.mubr.msk.bf16.mxu1 %vm1852_vm2, %v3317_v20 }
 0x5f5   : > { %3063 = vmatmul.mubr.msk.bf16.gmra.mrb[20].mxu1 %vm1852_vm2, %v3318_v36 }
 0x5f6   : > { %3066 = vmatprep.mubr.msk.bf16.mxu1 %vm1852_vm2, %v3319_v48 }
 0x5fd   : > { %3067 = vmatmul.mubr.msk.bf16.gmra.mrb[24].mxu1 %vm1852_vm2, %v3320_v49 }
 0x5fe   : > { %3070 = vmatprep.mubr.msk.bf16.mxu1 %vm1852_vm2, %v3321_v50  ;;  %v2237_v50 = vld [vmem:[%s4240_s18 + $0x30] sm:$0xff] }
 0x605   : > { %3071 = vmatmul.mubr.msk.bf16.gmra.mrb[28].mxu1 %vm1852_vm2, %v3322_v51 }
 0x606   : > { %3076 = vmatprep.mubr.msk.bf16.mxu1 %vm1852_vm2, %v3323_v52 }
 0x60d   : > { %3077 = vmatmul.mubr.msk.bf16.vlgmr.msra.gmra.mrb[32].mxu1 %vm1852_vm2, %v3324_v53 }
 0x60e   : > { %3080 = vmatprep.mubr.msk.bf16.mxu1 %vm1852_vm2, %v3325_v54 }
 0x615   : > { %3081 = vmatmul.mubr.msk.bf16.gmra.mrb[36].mxu1 %vm1852_vm2, %v3326_v55 }
 0x616   : > { %3084 = vmatprep.mubr.msk.bf16.mxu1 %vm1852_vm2, %v3327_v56 }
 0x61d   : > { %3085 = vmatmul.mubr.msk.bf16.gmra.mrb[40].mxu1 %vm1852_vm2, %v3328_v57  ;;  %v2235_v57 = vld [vmem:[%s4240_s18 + $0x20] sm:$0xff] }
 0x61e   : > { %3088 = vmatprep.mubr.msk.bf16.mxu1 %vm1852_vm2, %v3329_v60 }
 0x625   : > { %3089 = vmatmul.mubr.msk.bf16.gmra.mrb[44].mxu1 %vm1852_vm2, %v3330_v62 }
 0x6c0   : > { %v3060_v3 = vpop.f32.mrb[16].mxu1 }
 0x6c1   : > { %v1911_v16 = vpop.f32.mrb[17].mxu1 }
 0x6c2   : > { %v3061_v28 = vpop.f32.mrb[18].mxu1 }
 0x6c3   : > { %v4194_v59 = vpop.f32.mrb[19].mxu1 }
 0x6c8   : > { %v4196_v58 = vpop.f32.mrb[20].mxu1 }
 0x6c9   : > { %v4198_v61 = vpop.f32.mrb[21].mxu1 }
 0x6ca   : > { %v4200_v63 = vpop.f32.mrb[22].mxu1 }
 0x6cb   : > { %v4202_v0 = vpop.f32.mrb[23].mxu1 }
 0x6d0   : > { %v4204_v1 = vpop.f32.mrb[24].mxu1 }
 0x6d1   : > { %v4206_v4 = vpop.f32.mrb[25].mxu1 }
 0x6d2   : > { %v4208_v5 = vpop.f32.mrb[26].mxu1 }
 0x6d3   : > { %v4210_v6 = vpop.f32.mrb[27].mxu1 }
 0x6d8   : > { %v4212_v7 = vpop.f32.mrb[28].mxu1 }
 0x6d9   : > { %v4214_v8 = vpop.f32.mrb[29].mxu1 }
 0x6da   : > { %v4216_v9 = vpop.f32.mrb[30].mxu1 }
 0x6db   : > { %v4218_v10 = vpop.f32.mrb[31].mxu1 }
 0x6e0   : > { %v3078_v11 = vpop.f32.mrb[32].mxu1 }
 0x6e1   : > { %2171 = vrot.lane.b32.xlu0 %v3078_v11, %s3379_s16  ;;  %v2088_v18 = vpop.f32.mrb[33].mxu1 }
 0x6e2   : > { %v3079_v19 = vpop.f32.mrb[34].mxu1 }
 0x6e3   : > { %2173 = vrot.lane.b32.xlu1 %v3079_v19, %s3379_s16  ;;  %v2091_v22 = vpop.f32.mrb[35].mxu1 }
 0x6e5   : > { %2167 = vrot.lane.b32.xlu0 %v2088_v18, %s3379_s16  ;;  %v2236_v18 = vld [vmem:[%s4240_s18 + $0x28] sm:$0xff] }
 0x6e7   : > { %2169 = vrot.lane.b32.xlu1 %v2091_v22, %s3379_s16 }
 0x6e8   : > { %v3082_v23 = vpop.f32.mrb[36].mxu1 }
 0x6e9   : > { %2179 = vrot.lane.b32.xlu0 %v3082_v23, %s3379_s16  ;;  %v2104_v26 = vpop.f32.mrb[37].mxu1 }
 0x6ea   : > { %v3083_v27 = vpop.f32.mrb[38].mxu1 }
 0x6eb   : > { %2181 = vrot.lane.b32.xlu1 %v3083_v27, %s3379_s16  ;;  %v2107_v30 = vpop.f32.mrb[39].mxu1 }
 0x6ed   : > { %2175 = vrot.lane.b32.xlu0 %v2104_v26, %s3379_s16 }
 0x6ef   : > { %2177 = vrot.lane.b32.xlu1 %v2107_v30, %s3379_s16  ;;  %v2241_v30 = vld [vmem:[%s4240_s18 + $0x50] sm:$0xff] }
 0x6f0   : > { %v3086_v31 = vpop.f32.mrb[40].mxu1 }
 0x6f1   : > { %2187 = vrot.lane.b32.xlu0 %v3086_v31, %s3379_s16  ;;  %v2120_v34 = vpop.f32.mrb[41].mxu1 }
 0x6f2   : > { %v3087_v35 = vpop.f32.mrb[42].mxu1 }
 0x6f3   : > { %2189 = vrot.lane.b32.xlu1 %v3087_v35, %s3379_s16  ;;  %v2123_v38 = vpop.f32.mrb[43].mxu1 }
 0x6f5   : > { %2183 = vrot.lane.b32.xlu0 %v2120_v34, %s3379_s16 }
 0x6f7   : > { %2185 = vrot.lane.b32.xlu1 %v2123_v38, %s3379_s16 }
 0x6f8   : > { %v3090_v39 = vpop.f32.mrb[44].mxu1 }
 0x6f9   : > { %2195 = vrot.lane.b32.xlu0 %v3090_v39, %s3379_s16  ;;  %v2136_v42 = vpop.f32.mrb[45].mxu1 }
 0x6fa   : > { %v3091_v43 = vpop.f32.mrb[46].mxu1 }
 0x6fb   : > { %2197 = vrot.lane.b32.xlu1 %v3091_v43, %s3379_s16  ;;  %v2139_v46 = vpop.f32.mrb[47].mxu1 }
 0x6fd   : > { %2191 = vrot.lane.b32.xlu0 %v2136_v42, %s3379_s16  ;;  %v2239_v42 = vld [vmem:[%s4240_s18 + $0x40] sm:$0xff] }
 0x6ff   : > { %2193 = vrot.lane.b32.xlu1 %v2139_v46, %s3379_s16  ;;  %v2242_v46 = vld [vmem:[%s4240_s18 + $0x58] sm:$0xff] }
 0x753   : > { %v2172_v14 = vpop.permute.xlu0 %2171 }
 0x754   : > { %v2217_v15 = vsel %vm1537_vm1, %v3060_v3, %v2172_v14  ;;  %v2238_v3 = vld [vmem:[%s4240_s18 + $0x38] sm:$0xff] }
 0x755   : > { %v4248_v17 = vadd.f32 %v2233_v13, %v2217_v15  ;;  %v2174_v21 = vpop.permute.xlu1 %2173 }
 0x756   : > { %v2218_v2 = vsel %vm1537_vm1, %v3061_v28, %v2174_v21 }
 0x757   : > { %v2168_v12 = vpop.permute.xlu0 %2167  ;;  %v2270_v25 = vsel %vm2265_vm3, %v4248_v17, 0.0  ;;  %v4263_v45 = vadd.f32 %v2234_v29, %v2218_v2 }
 0x758   : > { %v2215_v32 = vsel %vm1537_vm1, %v1911_v16, %v2168_v12  ;;  %2304 = vadd.xlane.f32.xlu0 %v2270_v25  ;;  %v2286_v37 = vsub.f32 %v4248_v17, %v2270_v25  ;;  %v2240_v12 = vld [vmem:[%s4240_s18 + $0x48] sm:$0xff] }
 0x759   : > { %v4259_v40 = vadd.f32 %v2231_v24, %v2215_v32  ;;  %v2170_v41 = vpop.permute.xlu1 %2169  ;;  %v2271_v54 = vsel %vm2265_vm3, %v4263_v45, 0.0 }
 0x75a   : > { %v2216_v44 = vsel %vm1537_vm1, %v4194_v59, %v2170_v41  ;;  %2336 = vadd.xlane.f32.xlu1 %v2286_v37  ;;  %v2287_v62 = vsub.f32 %v4263_v45, %v2271_v54  ;;  %v2245_v37 = vld [vmem:[%s4240_s18 + $0x70] sm:$0xff] }
 0x75b   : > { %v4265_v20 = vadd.f32 %v2232_v33, %v2216_v44  ;;  %v2180_v36 = vpop.permute.xlu0 %2179  ;;  %v2268_v48 = vsel %vm2265_vm3, %v4259_v40, 0.0 }
 0x75c   : > { %2300 = vadd.xlane.f32.xlu0 %v2268_v48  ;;  %v2221_v51 = vsel %vm1537_vm1, %v4196_v58, %v2180_v36  ;;  %v2284_v55 = vsub.f32 %v4259_v40, %v2268_v48 }
 0x75d   : > { %v2269_v49 = vsel %vm2265_vm3, %v4265_v20, 0.0  ;;  %v2182_v52 = vpop.permute.xlu1 %2181  ;;  %v4280_v56 = vadd.f32 %v2237_v50, %v2221_v51  ;;  %v2243_v50 = vld [vmem:[%s4240_s18 + $0x60] sm:$0xff] }
 0x75e   : > { %2302 = vadd.xlane.f32.xlu1 %v2269_v49  ;;  %v2222_v16 = vsel %vm1537_vm1, %v4200_v63, %v2182_v52  ;;  %v2285_v11 = vsub.f32 %v4265_v20, %v2269_v49  ;;  %v2246_v52 = vld [vmem:[%s4240_s18 + $0x78] sm:$0xff] }
 0x75f   : > { %v2176_v53 = vpop.permute.xlu0 %2175  ;;  %v2274_v58 = vsel %vm2265_vm3, %v4280_v56, 0.0 }
 0x760   : > { %2306 = vadd.xlane.f32.xlu0 %v2271_v54  ;;  %v2219_v60 = vsel %vm1537_vm1, %v4198_v61, %v2176_v53  ;;  %v4295_v61 = vadd.f32 %v2238_v3, %v2222_v16  ;;  %v2290_v27 = vsub.f32 %v4280_v56, %v2274_v58 }
 0x761   : > { %v4289_v28 = vadd.f32 %v2235_v57, %v2219_v60  ;;  %v2178_v59 = vpop.permute.xlu1 %2177 }
 0x762   : > { %2332 = vadd.xlane.f32.xlu1 %v2284_v55  ;;  %v2220_v19 = vsel %vm1537_vm1, %v4202_v0, %v2178_v59  ;;  %v2275_v26 = vsel %vm2265_vm3, %v4295_v61, 0.0 }
 0x763   : > { %v2188_v63 = vpop.permute.xlu0 %2187  ;;  %v2272_v22 = vsel %vm2265_vm3, %v4289_v28, 0.0  ;;  %v4303_v23 = vadd.f32 %v2236_v18, %v2220_v19 }
 0x764   : > { %2338 = vadd.xlane.f32.xlu0 %v2287_v62  ;;  %v2225_v0 = vsel %vm1537_vm1, %v4204_v1, %v2188_v63  ;;  %v2288_v38 = vsub.f32 %v4289_v28, %v2272_v22  ;;  %v2291_v1 = vsub.f32 %v4295_v61, %v2275_v26 }
 0x765   : > { %v2190_v31 = vpop.permute.xlu1 %2189  ;;  %v2273_v35 = vsel %vm2265_vm3, %v4303_v23, 0.0  ;;  %v4316_v39 = vadd.f32 %v2241_v30, %v2225_v0 }
 0x766   : > { %2312 = vadd.xlane.f32.xlu1 %v2274_v58  ;;  %v2226_v13 = vsel %vm1537_vm1, %v4208_v5, %v2190_v31  ;;  %v2289_v24 = vsub.f32 %v4303_v23, %v2273_v35 }
 0x767   : > { %v2184_v34 = vpop.permute.xlu0 %2183  ;;  %v2278_v21 = vsel %vm2265_vm3, %v4316_v39, 0.0 }
 0x768   : > { %2334 = vadd.xlane.f32.xlu0 %v2285_v11  ;;  %v2223_v43 = vsel %vm1537_vm1, %v4206_v4, %v2184_v34  ;;  %v4331_v4 = vadd.f32 %v2242_v46, %v2226_v13  ;;  %v2294_v33 = vsub.f32 %v4316_v39, %v2278_v21 }
 0x769   : > { %v4325_v14 = vadd.f32 %v2239_v42, %v2223_v43  ;;  %v2186_v15 = vpop.permute.xlu1 %2185 }
 0x76a   : > { %2308 = vadd.xlane.f32.xlu1 %v2272_v22  ;;  %v2224_v25 = vsel %vm1537_vm1, %v4210_v6, %v2186_v15  ;;  %v2279_v32 = vsel %vm2265_vm3, %v4331_v4, 0.0 }
 0x76b   : > { %v2196_v5 = vpop.permute.xlu0 %2195  ;;  %v2276_v29 = vsel %vm2265_vm3, %v4325_v14, 0.0  ;;  %v4339_v2 = vadd.f32 %v2240_v12, %v2224_v25 }
 0x76c   : > { %2314 = vadd.xlane.f32.xlu0 %v2275_v26  ;;  %v2229_v6 = vsel %vm1537_vm1, %v4212_v7, %v2196_v5  ;;  %v2292_v48 = vsub.f32 %v4325_v14, %v2276_v29  ;;  %v2295_v7 = vsub.f32 %v4331_v4, %v2279_v32 }
 0x76d   : > { %v2198_v41 = vpop.permute.xlu1 %2197  ;;  %v2277_v36 = vsel %vm2265_vm3, %v4339_v2, 0.0  ;;  %v4352_v49 = vadd.f32 %v2245_v37, %v2229_v6 }
 0x76e   : > { %2344 = vadd.xlane.f32.xlu1 %v2290_v27  ;;  %v2230_v53 = vsel %vm1537_vm1, %v4216_v9, %v2198_v41  ;;  %v2293_v60 = vsub.f32 %v4339_v2, %v2277_v36 }
 0x76f   : > { %v2192_v44 = vpop.permute.xlu0 %2191  ;;  %v2282_v57 = vsel %vm2265_vm3, %v4352_v49, 0.0  ;;  %v4367_v62 = vadd.f32 %v2246_v52, %v2230_v53 }
 0x770   : > { %2310 = vadd.xlane.f32.xlu0 %v2273_v35  ;;  %v2227_v51 = vsel %vm1537_vm1, %v4214_v8, %v2192_v44  ;;  %v2244_v8 = vld [vmem:[%s4240_s18 + $0x68] sm:$0xff]  ;;  %v2298_v11 = vsub.f32 %v4352_v49, %v2282_v57 }
 0x771   : > { %v4361_v54 = vadd.f32 %v2243_v50, %v2227_v51  ;;  %v2194_v55 = vpop.permute.xlu1 %2193  ;;  %v2283_v59 = vsel %vm2265_vm3, %v4367_v62, 0.0 }
 0x772   : > { %2340 = vadd.xlane.f32.xlu1 %v2288_v38  ;;  %v2228_v3 = vsel %vm1537_vm1, %v4218_v10, %v2194_v55  ;;  %v2299_v19 = vsub.f32 %v4367_v62, %v2283_v59 }
 0x773   : > { %v2280_v9 = vsel %vm2265_vm3, %v4361_v54, 0.0  ;;  %v4375_v16 = vadd.f32 %v2244_v8, %v2228_v3 }
 0x774   : > { %2346 = vadd.xlane.f32.xlu0 %v2291_v1  ;;  %v2296_v58 = vsub.f32 %v4361_v54, %v2280_v9 }
 0x775   : > { %v2281_v10 = vsel %vm2265_vm3, %v4375_v16, 0.0 }
 0x776   : > { %2320 = vadd.xlane.f32.xlu1 %v2278_v21  ;;  %v2297_v18 = vsub.f32 %v4375_v16, %v2281_v10 }
 0x778   : > { %2342 = vadd.xlane.f32.xlu0 %v2289_v24 }
 0x77a   : > { %2316 = vadd.xlane.f32.xlu1 %v2276_v29 }
 0x77c   : > { %2322 = vadd.xlane.f32.xlu0 %v2279_v32 }
 0x77e   : > { %2352 = vadd.xlane.f32.xlu1 %v2294_v33 }
 0x780   : > { %2318 = vadd.xlane.f32.xlu0 %v2277_v36 }
 0x782   : > { %2348 = vadd.xlane.f32.xlu1 %v2292_v48 }
 0x784   : > { %2354 = vadd.xlane.f32.xlu0 %v2295_v7 }
 0x786   : > { %2328 = vadd.xlane.f32.xlu1 %v2282_v57 }
 0x788   : > { %2350 = vadd.xlane.f32.xlu0 %v2293_v60 }
 0x78a   : > { %2324 = vadd.xlane.f32.xlu1 %v2280_v9 }
 0x78c   : > { %2330 = vadd.xlane.f32.xlu0 %v2283_v59 }
 0x78e   : > { %2356 = vadd.xlane.f32.xlu1 %v2296_v58 }
 0x790   : > { %2326 = vadd.xlane.f32.xlu0 %v2281_v10 }
 0x792   : > { %2360 = vadd.xlane.f32.xlu1 %v2298_v11 }
 0x794   : > { %2358 = vadd.xlane.f32.xlu0 %v2297_v18 }
 0x798   : > { %2362 = vadd.xlane.f32.xlu0 %v2299_v19 }
 0x7e5   : > { %v2305_v63 = vpop.xlane.xlu0 %2304 }
 0x7e7   : > { %v2337_v22 = vpop.xlane.xlu1 %2336 }
 0x7e8   : > { %v2366_v26 = vsel %vm2265_vm3, %v2305_v63, %v2337_v22 }
 0x7e9   : > { %v2382_v27 = vmul.f32 0.015625, %v2366_v26  ;;  %v2301_v30 = vpop.xlane.xlu0 %2300 }
 0x7eb   : > { %v4390_v0 = vsub.f32 %v4248_v17, %v2382_v27  ;;  %v2303_v31 = vpop.xlane.xlu1 %2302 }
 0x7ed   : > { %v2307_v34 = vpop.xlane.xlu0 %2306  ;;  %v2414_v35 = vsel %vm2265_vm3, %v4390_v0, 0.0 }
 0x7ee   : > { %v2446_v38 = vmul.f32 %v2414_v35, %v2414_v35  ;;  %v2430_v32 = vsub.f32 %v4390_v0, %v2414_v35 }
 0x7ef   : > { %v2333_v42 = vpop.xlane.xlu1 %2332 }
 0x7f0   : > { %v2364_v43 = vsel %vm2265_vm3, %v2301_v30, %v2333_v42  ;;  %2464 = vadd.xlane.f32.xlu1 %v2446_v38  ;;  %v2494_v44 = vmul.f32 %v2430_v32, %v2430_v32 }
 0x7f1   : > { %v2380_v1 = vmul.f32 0.015625, %v2364_v43  ;;  %v2339_v46 = vpop.xlane.xlu0 %2338 }
 0x7f2   : > { %v2367_v13 = vsel %vm2265_vm3, %v2307_v34, %v2339_v46 }
 0x7f3   : > { %v4400_v17 = vsub.f32 %v4259_v40, %v2380_v1  ;;  %v2383_v15 = vmul.f32 0.015625, %v2367_v13  ;;  %v2313_v21 = vpop.xlane.xlu1 %2312 }
 0x7f5   : > { %v4403_v24 = vsub.f32 %v4263_v45, %v2383_v15  ;;  %v2335_v12 = vpop.xlane.xlu0 %2334  ;;  %v2412_v25 = vsel %vm2265_vm3, %v4400_v17, 0.0 }
 0x7f6   : > { %v2365_v5 = vsel %vm2265_vm3, %v2303_v31, %v2335_v12  ;;  %v2444_v29 = vmul.f32 %v2412_v25, %v2412_v25  ;;  %v2428_v36 = vsub.f32 %v4400_v17, %v2412_v25 }
 0x7f7   : > { %v2381_v33 = vmul.f32 0.015625, %v2365_v5  ;;  %v2309_v37 = vpop.xlane.xlu1 %2308  ;;  %v2415_v40 = vsel %vm2265_vm3, %v4403_v24, 0.0 }
 0x7f8   : > { %2460 = vadd.xlane.f32.xlu1 %v2444_v29  ;;  %v2447_v45 = vmul.f32 %v2415_v40, %v2415_v40  ;;  %v2431_v52 = vsub.f32 %v4403_v24, %v2415_v40  ;;  %v2492_v55 = vmul.f32 %v2428_v36, %v2428_v36 }
 0x7f9   : > { %v4415_v6 = vsub.f32 %v4265_v20, %v2381_v33  ;;  %v2315_v41 = vpop.xlane.xlu0 %2314 }
 0x7fa   : > { %2466 = vadd.xlane.f32.xlu0 %v2447_v45  ;;  %v2495_v3 = vmul.f32 %v2431_v52, %v2431_v52 }
 0x7fb   : > { %v2345_v48 = vpop.xlane.xlu1 %2344  ;;  %v2413_v50 = vsel %vm2265_vm3, %v4415_v6, 0.0 }
 0x7fc   : > { %v2370_v51 = vsel %vm2265_vm3, %v2313_v21, %v2345_v48  ;;  %2512 = vadd.xlane.f32.xlu1 %v2494_v44  ;;  %v2445_v7 = vmul.f32 %v2413_v50, %v2413_v50  ;;  %v2429_v9 = vsub.f32 %v4415_v6, %v2413_v50 }
 0x7fd   : > { %v2386_v53 = vmul.f32 0.015625, %v2370_v51  ;;  %v2311_v20 = vpop.xlane.xlu0 %2310 }
 0x7fe   : > { %2462 = vadd.xlane.f32.xlu0 %v2445_v7  ;;  %v2493_v22 = vmul.f32 %v2429_v9, %v2429_v9 }
 0x7ff   : > { %v4425_v57 = vsub.f32 %v4280_v56, %v2386_v53  ;;  %v2341_v60 = vpop.xlane.xlu1 %2340 }
 0x800   : > { %v2368_v8 = vsel %vm2265_vm3, %v2309_v37, %v2341_v60  ;;  %2508 = vadd.xlane.f32.xlu1 %v2492_v55 }
 0x801   : > { %v2384_v59 = vmul.f32 0.015625, %v2368_v8  ;;  %v2347_v58 = vpop.xlane.xlu0 %2346  ;;  %v2418_v10 = vsel %vm2265_vm3, %v4425_v57, 0.0 }
 0x802   : > { %v2371_v11 = vsel %vm2265_vm3, %v2315_v41, %v2347_v58  ;;  %2514 = vadd.xlane.f32.xlu0 %v2495_v3  ;;  %v2450_v56 = vmul.f32 %v2418_v10, %v2418_v10 }
 0x803   : > { %v4436_v18 = vsub.f32 %v4289_v28, %v2384_v59  ;;  %v2387_v19 = vmul.f32 0.015625, %v2371_v11  ;;  %v2321_v63 = vpop.xlane.xlu1 %2320  ;;  %v2434_v28 = vsub.f32 %v4425_v57, %v2418_v10 }
 0x804   : > { %2472 = vadd.xlane.f32.xlu1 %v2450_v56 }
 0x805   : > { %v4439_v26 = vsub.f32 %v4295_v61, %v2387_v19  ;;  %v2343_v27 = vpop.xlane.xlu0 %2342  ;;  %v2416_v30 = vsel %vm2265_vm3, %v4436_v18, 0.0  ;;  %v2498_v46 = vmul.f32 %v2434_v28, %v2434_v28 }
 0x806   : > { %v2369_v31 = vsel %vm2265_vm3, %v2311_v20, %v2343_v27  ;;  %2510 = vadd.xlane.f32.xlu0 %v2493_v22  ;;  %v2448_v34 = vmul.f32 %v2416_v30, %v2416_v30  ;;  %v2432_v13 = vsub.f32 %v4436_v18, %v2416_v30 }
 0x807   : > { %v2385_v35 = vmul.f32 0.015625, %v2369_v31  ;;  %v2317_v38 = vpop.xlane.xlu1 %2316  ;;  %v2419_v42 = vsel %vm2265_vm3, %v4439_v26, 0.0 }
 0x808   : > { %2468 = vadd.xlane.f32.xlu1 %v2448_v34  ;;  %v2451_v61 = vmul.f32 %v2419_v42, %v2419_v42  ;;  %v2435_v5 = vsub.f32 %v4439_v26, %v2419_v42  ;;  %v2496_v32 = vmul.f32 %v2432_v13, %v2432_v13 }
 0x809   : > { %v4451_v43 = vsub.f32 %v4303_v23, %v2385_v35  ;;  %v2323_v1 = vpop.xlane.xlu0 %2322 }
 0x80a   : > { %2474 = vadd.xlane.f32.xlu0 %v2451_v61  ;;  %v2499_v45 = vmul.f32 %v2435_v5, %v2435_v5 }
 0x80b   : > { %v2353_v15 = vpop.xlane.xlu1 %2352  ;;  %v2417_v21 = vsel %vm2265_vm3, %v4451_v43, 0.0 }
 0x80c   : > { %v2374_v12 = vsel %vm2265_vm3, %v2321_v63, %v2353_v15  ;;  %2520 = vadd.xlane.f32.xlu1 %v2498_v46  ;;  %v2449_v25 = vmul.f32 %v2417_v21, %v2417_v21  ;;  %v2433_v41 = vsub.f32 %v4451_v43, %v2417_v21 }
 0x80d   : > { %v2390_v29 = vmul.f32 0.015625, %v2374_v12  ;;  %v2319_v23 = vpop.xlane.xlu0 %2318 }
 0x80e   : > { %2470 = vadd.xlane.f32.xlu0 %v2449_v25  ;;  %v2497_v53 = vmul.f32 %v2433_v41, %v2433_v41 }
 0x80f   : > { %v4461_v33 = vsub.f32 %v4316_v39, %v2390_v29  ;;  %v2349_v37 = vpop.xlane.xlu1 %2348 }
 0x810   : > { %v2372_v40 = vsel %vm2265_vm3, %v2317_v38, %v2349_v37  ;;  %2516 = vadd.xlane.f32.xlu1 %v2496_v32 }
 0x811   : > { %v2388_v44 = vmul.f32 0.015625, %v2372_v40  ;;  %v2355_v36 = vpop.xlane.xlu0 %2354  ;;  %v2422_v48 = vsel %vm2265_vm3, %v4461_v33, 0.0 }
 0x812   : > { %v2375_v50 = vsel %vm2265_vm3, %v2323_v1, %v2355_v36  ;;  %2522 = vadd.xlane.f32.xlu0 %v2499_v45  ;;  %v2454_v39 = vmul.f32 %v2422_v48, %v2422_v48 }
 0x813   : > { %v4472_v51 = vsub.f32 %v4325_v14, %v2388_v44  ;;  %v2391_v7 = vmul.f32 0.015625, %v2375_v50  ;;  %v2329_v52 = vpop.xlane.xlu1 %2328  ;;  %v2438_v14 = vsub.f32 %v4461_v33, %v2422_v48 }
 0x814   : > { %2480 = vadd.xlane.f32.xlu1 %v2454_v39 }
 0x815   : > { %v4475_v20 = vsub.f32 %v4331_v4, %v2391_v7  ;;  %v2351_v55 = vpop.xlane.xlu0 %2350  ;;  %v2420_v60 = vsel %vm2265_vm3, %v4472_v51, 0.0  ;;  %v2502_v56 = vmul.f32 %v2438_v14, %v2438_v14 }
 0x816   : > { %v2373_v8 = vsel %vm2265_vm3, %v2319_v23, %v2351_v55  ;;  %2518 = vadd.xlane.f32.xlu0 %v2497_v53  ;;  %v2452_v3 = vmul.f32 %v2420_v60, %v2420_v60  ;;  %v2436_v19 = vsub.f32 %v4472_v51, %v2420_v60 }
 0x817   : > { %v2389_v9 = vmul.f32 0.015625, %v2373_v8  ;;  %v2325_v59 = vpop.xlane.xlu1 %2324  ;;  %v2423_v58 = vsel %vm2265_vm3, %v4475_v20, 0.0 }
 0x818   : > { %2476 = vadd.xlane.f32.xlu1 %v2452_v3  ;;  %v2455_v4 = vmul.f32 %v2423_v58, %v2423_v58  ;;  %v2439_v31 = vsub.f32 %v4475_v20, %v2423_v58 }
 0x819   : > { %v4487_v10 = vsub.f32 %v4339_v2, %v2389_v9  ;;  %v2331_v11 = vpop.xlane.xlu0 %2330  ;;  %v2500_v2 = vmul.f32 %v2436_v19, %v2436_v19 }
 0x81a   : > { %2482 = vadd.xlane.f32.xlu0 %v2455_v4  ;;  %v2503_v61 = vmul.f32 %v2439_v31, %v2439_v31 }
 0x81b   : > { %v2357_v63 = vpop.xlane.xlu1 %2356  ;;  %v2421_v22 = vsel %vm2265_vm3, %v4487_v10, 0.0 }
 0x81c   : > { %v2376_v27 = vsel %vm2265_vm3, %v2325_v59, %v2357_v63  ;;  %2528 = vadd.xlane.f32.xlu1 %v2502_v56  ;;  %v2453_v30 = vmul.f32 %v2421_v22, %v2421_v22  ;;  %v2437_v38 = vsub.f32 %v4487_v10, %v2421_v22 }
 0x81d   : > { %v2327_v34 = vpop.xlane.xlu0 %2326  ;;  %v2392_v28 = vmul.f32 0.015625, %v2376_v27 }
 0x81e   : > { %2478 = vadd.xlane.f32.xlu0 %v2453_v30  ;;  %v2501_v12 = vmul.f32 %v2437_v38, %v2437_v38 }
 0x81f   : > { %v2361_v35 = vpop.xlane.xlu1 %2360  ;;  %v4502_v15 = vsub.f32 %v4361_v54, %v2392_v28 }
 0x820   : > { %v2378_v42 = vsel %vm2265_vm3, %v2329_v52, %v2361_v35  ;;  %2524 = vadd.xlane.f32.xlu1 %v2500_v2 }
 0x821   : > { %v2394_v1 = vmul.f32 0.015625, %v2378_v42  ;;  %v2359_v46 = vpop.xlane.xlu0 %2358  ;;  %v2424_v54 = vsel %vm2265_vm3, %v4502_v15, 0.0 }
 0x822   : > { %v2377_v13 = vsel %vm2265_vm3, %v2327_v34, %v2359_v46  ;;  %2530 = vadd.xlane.f32.xlu0 %v2503_v61  ;;  %v2456_v45 = vmul.f32 %v2424_v54, %v2424_v54  ;;  %v2440_v41 = vsub.f32 %v4502_v15, %v2424_v54  ;;  %v4542_v46 = vld [vmem:[%s4655_s9] ss:$0 sm:$0xff] }
 0x823   : > { %v4505_v21 = vsub.f32 %v4352_v49, %v2394_v1  ;;  %v2393_v25 = vmul.f32 0.015625, %v2377_v13 }
 0x825   : > { %v2363_v5 = vpop.xlane.xlu0 %2362  ;;  %v2426_v29 = vsel %vm2265_vm3, %v4505_v21, 0.0  ;;  %v4516_v49 = vsub.f32 %v4375_v16, %v2393_v25  ;;  %v2504_v16 = vmul.f32 %v2440_v41, %v2440_v41 }
 0x826   : > { %v2379_v23 = vsel %vm2265_vm3, %v2331_v11, %v2363_v5  ;;  %2526 = vadd.xlane.f32.xlu0 %v2501_v12  ;;  %v2458_v32 = vmul.f32 %v2426_v29, %v2426_v29  ;;  %v2442_v50 = vsub.f32 %v4505_v21, %v2426_v29  ;;  %v4550_v5 = vld [vmem:[%s4656_s10] ss:$0 sm:$0xff] }
 0x827   : > { %v2395_v37 = vmul.f32 0.015625, %v2379_v23  ;;  %v2425_v48 = vsel %vm2265_vm3, %v4516_v49, 0.0 }
 0x828   : > { %2488 = vadd.xlane.f32.xlu1 %v2458_v32  ;;  %v2441_v39 = vsub.f32 %v4516_v49, %v2425_v48  ;;  %v2506_v7 = vmul.f32 %v2442_v50, %v2442_v50 }
 0x829   : > { %v4519_v40 = vsub.f32 %v4367_v62, %v2395_v37  ;;  %v2457_v62 = vmul.f32 %v2425_v48, %v2425_v48 }
 0x82a   : > { %v2505_v52 = vmul.f32 %v2441_v39, %v2441_v39 }
 0x82b   : > { %v2427_v44 = vsel %vm2265_vm3, %v4519_v40, 0.0 }
 0x82c   : > { %2484 = vadd.xlane.f32.xlu1 %v2456_v45  ;;  %v2459_v36 = vmul.f32 %v2427_v44, %v2427_v44  ;;  %v2443_v53 = vsub.f32 %v4519_v40, %v2427_v44 }
 0x82e   : > { %2490 = vadd.xlane.f32.xlu0 %v2459_v36  ;;  %v2507_v55 = vmul.f32 %v2443_v53, %v2443_v53 }
 0x830   : > { %2532 = vadd.xlane.f32.xlu1 %v2504_v16 }
 0x832   : > { %2486 = vadd.xlane.f32.xlu0 %v2457_v62 }
 0x834   : > { %2536 = vadd.xlane.f32.xlu1 %v2506_v7 }
 0x836   : > { %2534 = vadd.xlane.f32.xlu0 %v2505_v52 }
 0x83a   : > { %2538 = vadd.xlane.f32.xlu0 %v2507_v55 }
 0x87d   : > { %v2465_v60 = vpop.xlane.xlu1 %2464 }
 0x885   : > { %v2461_v8 = vpop.xlane.xlu1 %2460 }
 0x887   : > { %v2467_v3 = vpop.xlane.xlu0 %2466 }
 0x889   : > { %v2513_v14 = vpop.xlane.xlu1 %2512 }
 0x88a   : > { %v2542_v9 = vsel %vm2265_vm3, %v2465_v60, %v2513_v14 }
 0x88b   : > { %v2558_v59 = vmul.f32 0.015625, %v2542_v9  ;;  %v2463_v58 = vpop.xlane.xlu0 %2462 }
 0x88d   : > { %v2574_v4 = vadd.f32 1e-05, %v2558_v59  ;;  %v2509_v11 = vpop.xlane.xlu1 %2508 }
 0x88e   : > { %v2540_v56 = vsel %vm2265_vm3, %v2461_v8, %v2509_v11 }
 0x88f   : > { %3339 = vrsqrt.f32 %v2574_v4  ;;  %v2556_v19 = vmul.f32 0.015625, %v2540_v56  ;;  %v2515_v63 = vpop.xlane.xlu0 %2514 }
 0x890   : > { %v2543_v22 = vsel %vm2265_vm3, %v2467_v3, %v2515_v63 }
 0x891   : > { %v2572_v27 = vadd.f32 1e-05, %v2556_v19  ;;  %v2559_v30 = vmul.f32 0.015625, %v2543_v22  ;;  %v2473_v31 = vpop.xlane.xlu1 %2472 }
 0x893   : > { %3341 = vrsqrt.f32 %v2572_v27  ;;  %v2575_v34 = vadd.f32 1e-05, %v2559_v30  ;;  %v2511_v2 = vpop.xlane.xlu0 %2510 }
 0x894   : > { %v2541_v28 = vsel %vm2265_vm3, %v2463_v58, %v2511_v2 }
 0x895   : > { %3343 = vrsqrt.f32 %v2575_v34  ;;  %v2557_v35 = vmul.f32 0.015625, %v2541_v28  ;;  %v2469_v38 = vpop.xlane.xlu1 %2468 }
 0x897   : > { %v2573_v42 = vadd.f32 1e-05, %v2557_v35  ;;  %v2475_v61 = vpop.xlane.xlu0 %2474 }
 0x899   : > { %v3340_v1 = vpop.eup %3339  ;;  %3345 = vrsqrt.f32 %v2573_v42  ;;  %v2521_v13 = vpop.xlane.xlu1 %2520 }
 0x89a   : > { %v2606_v12 = vmul.f32 %v3340_v1, %v4390_v0  ;;  %v2546_v25 = vsel %vm2265_vm3, %v2473_v31, %v2521_v13 }
 0x89b   : > { %v2562_v29 = vmul.f32 0.015625, %v2546_v25  ;;  %v2471_v23 = vpop.xlane.xlu0 %2470 }
 0x89c   : > { %v2629_v32 = vmul.f32 %v4542_v46, %v2606_v12 }
 0x89d   : > { %v3342_v37 = vpop.eup %3341  ;;  %v2578_v0 = vadd.f32 1e-05, %v2562_v29  ;;  %v2517_v54 = vpop.xlane.xlu1 %2516 }
 0x89e   : > { %v2652_v45 = vadd.f32 %v4550_v5, %v2629_v32  ;;  %v2604_v41 = vmul.f32 %v3342_v37, %v4400_v17  ;;  %v2544_v44 = vsel %vm2265_vm3, %v2469_v38, %v2517_v54 }
 0x89f   : > { %v3344_v36 = vpop.eup %3343  ;;  %3347 = vrsqrt.f32 %v2578_v0  ;;  %v2560_v48 = vmul.f32 0.015625, %v2544_v44  ;;  %v2523_v50 = vpop.xlane.xlu0 %2522 }
 0x8a0   : > { %2668 = vst [vmem:[%s4557_s15 + $0x10] sm:$0xff] %v2652_v45  ;;  %v2627_v16 = vmul.f32 %v4542_v46, %v2604_v41  ;;  %v2607_v62 = vmul.f32 %v3344_v36, %v4403_v24  ;;  %v2547_v39 = vsel %vm2265_vm3, %v2475_v61, %v2523_v50 }
 0x8a1   : > { %v2576_v7 = vadd.f32 1e-05, %v2560_v48  ;;  %v2563_v52 = vmul.f32 0.015625, %v2547_v39  ;;  %v2481_v17 = vpop.xlane.xlu1 %2480 }
 0x8a2   : > { %v2650_v53 = vadd.f32 %v4550_v5, %v2627_v16  ;;  %v2630_v55 = vmul.f32 %v4542_v46, %v2607_v62 }
 0x8a3   : > { %v3346_v60 = vpop.eup %3345  ;;  %3349 = vrsqrt.f32 %v2576_v7  ;;  %v2579_v8 = vadd.f32 1e-05, %v2563_v52  ;;  %v2519_v3 = vpop.xlane.xlu0 %2518 }
 0x8a4   : > { %2666 = vst [vmem:[%s4557_s15] sm:$0xff] %v2650_v53  ;;  %v2653_v14 = vadd.f32 %v4550_v5, %v2630_v55  ;;  %v2605_v24 = vmul.f32 %v3346_v60, %v4415_v6  ;;  %v2545_v9 = vsel %vm2265_vm3, %v2471_v23, %v2519_v3 }
 0x8a5   : > { %3351 = vrsqrt.f32 %v2579_v8  ;;  %v2561_v59 = vmul.f32 0.015625, %v2545_v9  ;;  %v2477_v58 = vpop.xlane.xlu1 %2476 }
 0x8a6   : > { %2669 = vst [vmem:[%s4557_s15 + $0x18] sm:$0xff] %v2653_v14  ;;  %v2628_v4 = vmul.f32 %v4542_v46, %v2605_v24 }
 0x8a7   : > { %v2577_v11 = vadd.f32 1e-05, %v2561_v59  ;;  %v2483_v56 = vpop.xlane.xlu0 %2482 }
 0x8a8   : > { %v2651_v19 = vadd.f32 %v4550_v5, %v2628_v4 }
 0x8a9   : > { %v3348_v63 = vpop.eup %3347  ;;  %3353 = vrsqrt.f32 %v2577_v11  ;;  %v2529_v22 = vpop.xlane.xlu1 %2528 }
 0x8aa   : > { %2667 = vst [vmem:[%s4557_s15 + $0x8] sm:$0xff] %v2651_v19  ;;  %v2610_v6 = vmul.f32 %v3348_v63, %v4425_v57  ;;  %v2550_v27 = vsel %vm2265_vm3, %v2481_v17, %v2529_v22 }
 0x8ab   : > { %v2566_v30 = vmul.f32 0.015625, %v2550_v27  ;;  %v2479_v31 = vpop.xlane.xlu0 %2478 }
 0x8ac   : > { %v2633_v34 = vmul.f32 %v4542_v46, %v2610_v6 }
 0x8ad   : > { %v3350_v2 = vpop.eup %3349  ;;  %v2582_v28 = vadd.f32 1e-05, %v2566_v30  ;;  %v2525_v35 = vpop.xlane.xlu1 %2524 }
 0x8ae   : > { %v2656_v38 = vadd.f32 %v4550_v5, %v2633_v34  ;;  %v2608_v42 = vmul.f32 %v3350_v2, %v4436_v18  ;;  %v2548_v61 = vsel %vm2265_vm3, %v2477_v58, %v2525_v35 }
 0x8af   : > { %v3352_v1 = vpop.eup %3351  ;;  %3355 = vrsqrt.f32 %v2582_v28  ;;  %v2564_v57 = vmul.f32 0.015625, %v2548_v61  ;;  %v2531_v13 = vpop.xlane.xlu0 %2530 }
 0x8b0   : > { %2672 = vst [vmem:[%s4557_s15 + $0x30] sm:$0xff] %v2656_v38  ;;  %v2631_v12 = vmul.f32 %v4542_v46, %v2608_v42  ;;  %v2611_v25 = vmul.f32 %v3352_v1, %v4439_v26  ;;  %v2551_v29 = vsel %vm2265_vm3, %v2483_v56, %v2531_v13 }
 0x8b1   : > { %v2580_v23 = vadd.f32 1e-05, %v2564_v57  ;;  %v2567_v32 = vmul.f32 0.015625, %v2551_v29 }
 0x8b2   : > { %v2654_v18 = vadd.f32 %v4550_v5, %v2631_v12  ;;  %v2634_v37 = vmul.f32 %v4542_v46, %v2611_v25 }
 0x8b3   : > { %v3354_v0 = vpop.eup %3353  ;;  %3357 = vrsqrt.f32 %v2580_v23  ;;  %v2583_v54 = vadd.f32 1e-05, %v2567_v32  ;;  %v2527_v45 = vpop.xlane.xlu0 %2526 }
 0x8b4   : > { %2670 = vst [vmem:[%s4557_s15 + $0x20] sm:$0xff] %v2654_v18  ;;  %v2657_v41 = vadd.f32 %v4550_v5, %v2634_v37  ;;  %v2609_v26 = vmul.f32 %v3354_v0, %v4451_v43  ;;  %v2549_v44 = vsel %vm2265_vm3, %v2479_v31, %v2527_v45 }
 0x8b5   : > { %3359 = vrsqrt.f32 %v2583_v54  ;;  %v2565_v36 = vmul.f32 0.015625, %v2549_v44  ;;  %v2489_v48 = vpop.xlane.xlu1 %2488 }
 0x8b6   : > { %2673 = vst [vmem:[%s4557_s15 + $0x38] sm:$0xff] %v2657_v41  ;;  %v2632_v50 = vmul.f32 %v4542_v46, %v2609_v26 }
 0x8b7   : > { %v2581_v16 = vadd.f32 1e-05, %v2565_v36 }
 0x8b8   : > { %v2655_v62 = vadd.f32 %v4550_v5, %v2632_v50 }
 0x8b9   : > { %v3356_v39 = vpop.eup %3355  ;;  %3361 = vrsqrt.f32 %v2581_v16  ;;  %v2485_v7 = vpop.xlane.xlu1 %2484 }
 0x8ba   : > { %2671 = vst [vmem:[%s4557_s15 + $0x28] sm:$0xff] %v2655_v62  ;;  %v2614_v52 = vmul.f32 %v3356_v39, %v4461_v33 }
 0x8bb   : > { %v2491_v43 = vpop.xlane.xlu0 %2490 }
 0x8bc   : > { %v2637_v17 = vmul.f32 %v4542_v46, %v2614_v52 }
 0x8bd   : > { %v3358_v53 = vpop.eup %3357  ;;  %v2533_v55 = vpop.xlane.xlu1 %2532 }
 0x8be   : > { %v2660_v60 = vadd.f32 %v4550_v5, %v2637_v17  ;;  %v2612_v8 = vmul.f32 %v3358_v53, %v4472_v51  ;;  %v2552_v3 = vsel %vm2265_vm3, %v2485_v7, %v2533_v55 }
 0x8bf   : > { %v3360_v14 = vpop.eup %3359  ;;  %v2568_v24 = vmul.f32 0.015625, %v2552_v3  ;;  %v2487_v9 = vpop.xlane.xlu0 %2486 }
 0x8c0   : > { %2676 = vst [vmem:[%s4557_s15 + $0x50] sm:$0xff] %v2660_v60  ;;  %v2635_v59 = vmul.f32 %v4542_v46, %v2612_v8  ;;  %v2615_v33 = vmul.f32 %v3360_v14, %v4475_v20 }
 0x8c1   : > { %v2584_v58 = vadd.f32 1e-05, %v2568_v24  ;;  %v2537_v4 = vpop.xlane.xlu1 %2536 }
 0x8c2   : > { %v2658_v11 = vadd.f32 %v4550_v5, %v2635_v59  ;;  %v2638_v56 = vmul.f32 %v4542_v46, %v2615_v33  ;;  %v2554_v51 = vsel %vm2265_vm3, %v2489_v48, %v2537_v4 }
 0x8c3   : > { %v3362_v19 = vpop.eup %3361  ;;  %3363 = vrsqrt.f32 %v2584_v58  ;;  %v2570_v63 = vmul.f32 0.015625, %v2554_v51  ;;  %v2535_v22 = vpop.xlane.xlu0 %2534 }
 0x8c4   : > { %2674 = vst [vmem:[%s4557_s15 + $0x40] sm:$0xff] %v2658_v11  ;;  %v2661_v6 = vadd.f32 %v4550_v5, %v2638_v56  ;;  %v2613_v20 = vmul.f32 %v3362_v19, %v4487_v10  ;;  %v2553_v27 = vsel %vm2265_vm3, %v2487_v9, %v2535_v22 }
 0x8c5   : > { %v2586_v30 = vadd.f32 1e-05, %v2570_v63  ;;  %v2569_v31 = vmul.f32 0.015625, %v2553_v27 }
 0x8c6   : > { %2677 = vst [vmem:[%s4557_s15 + $0x58] sm:$0xff] %v2661_v6  ;;  %v2636_v34 = vmul.f32 %v4542_v46, %v2613_v20 }
 0x8c7   : > { %3365 = vrsqrt.f32 %v2586_v30  ;;  %v2585_v2 = vadd.f32 1e-05, %v2569_v31  ;;  %v2539_v28 = vpop.xlane.xlu0 %2538 }
 0x8c8   : > { %v2659_v35 = vadd.f32 %v4550_v5, %v2636_v34  ;;  %v2555_v38 = vsel %vm2265_vm3, %v2491_v43, %v2539_v28 }
 0x8c9   : > { %3367 = vrsqrt.f32 %v2585_v2  ;;  %v2571_v42 = vmul.f32 0.015625, %v2555_v38 }
 0x8ca   : > { %2675 = vst [vmem:[%s4557_s15 + $0x48] sm:$0xff] %v2659_v35 }
 0x8cb   : > { %v2587_v10 = vadd.f32 1e-05, %v2571_v42 }
 0x8cd   : > { %v3364_v61 = vpop.eup %3363  ;;  %3369 = vrsqrt.f32 %v2587_v10 }
 0x8ce   : > { %v2616_v1 = vmul.f32 %v3364_v61, %v4502_v15 }
 0x8d0   : > { %v2639_v57 = vmul.f32 %v4542_v46, %v2616_v1 }
 0x8d1   : > { %v3366_v13 = vpop.eup %3365 }
 0x8d2   : > { %v2662_v12 = vadd.f32 %v4550_v5, %v2639_v57  ;;  %v2618_v25 = vmul.f32 %v3366_v13, %v4505_v21 }
 0x8d3   : > { %v3368_v47 = vpop.eup %3367 }
 0x8d4   : > { %2678 = vst [vmem:[%s4557_s15 + $0x60] sm:$0xff] %v2662_v12  ;;  %v2641_v29 = vmul.f32 %v4542_v46, %v2618_v25  ;;  %v2617_v23 = vmul.f32 %v3368_v47, %v4516_v49 }
 0x8d6   : > { %v2664_v32 = vadd.f32 %v4550_v5, %v2641_v29  ;;  %v2640_v18 = vmul.f32 %v4542_v46, %v2617_v23 }
 0x8d7   : > { %v3370_v37 = vpop.eup %3369 }
 0x8d8   : > { %2680 = vst [vmem:[%s4557_s15 + $0x70] sm:$0xff] %v2664_v32  ;;  %v2663_v15 = vadd.f32 %v4550_v5, %v2640_v18  ;;  %v2619_v0 = vmul.f32 %v3370_v37, %v4519_v40 }
 0x8da   : > { %2679 = vst [vmem:[%s4557_s15 + $0x68] sm:$0xff] %v2663_v15  ;;  %v2642_v54 = vmul.f32 %v4542_v46, %v2619_v0 }
 0x8dc   : > { %v2665_v21 = vadd.f32 %v4550_v5, %v2642_v54 }
 0x8de   : > { %2681 = vst [vmem:[%s4557_s15 + $0x78] sm:$0xff] %v2665_v21 }
 0x8df PF: > { %s21_s17 = sadd.s32 1, %s3377_s17  }
 0x8e0   : > { %p18_p4 = scmp.ge.s32.totalorder %s21_s17, 4  }
 0x8e2   :  { %20 = sbr.rel (!%p18_p4) target bundleno = 1 (0x1), region = 97 }

</bundles_post_ra>
